<compile_context>
chip_gen: v5e
topology: v5e:2x2
jax: 0.10.0
libtpu: 0.0.40
codegen_flags: <defaults>
</compile_context>

<pallas_src>
import jax
import jax.numpy as jnp
from jax import lax
from jax.experimental import pallas as pl
from jax.experimental.pallas import tpu as pltpu


def _layer_norm(h, g, b, eps=1e-12):
    mu = jnp.mean(h, axis=-1, keepdims=True)
    var = jnp.mean((h - mu) ** 2, axis=-1, keepdims=True)
    return (h - mu) * lax.rsqrt(var + eps) * g + b


def _gelu(x):
    # TODO(synk): HF BERT/RoBERTa default is the exact erf GELU; this is the tanh
    # approximation (EUP transcendental), ~1e-3 relative difference vs the reference.
    c = jnp.float32(0.7978845608028654)  # sqrt(2/pi)
    return 0.5 * x * (1.0 + jnp.tanh(c * (x + 0.044715 * x * x * x)))


def encoder_layer_kernel(x_kv_ref, x_q_ref, mask_ref,
                         ln0g, ln0b,
                         wq, bq, wkv, bkv, wo, bo,
                         ln1g, ln1b,
                         w1, b1, w2, b2,
                         ln2g, ln2b,
                         out_ref, attn_ref,
                         ctx_scratch):
    x_all = x_kv_ref[0].astype(jnp.float32)    # (S, H)   rows feeding K/V
    x_q = x_q_ref[0].astype(jnp.float32)       # (TQ, H)  query-row tile
    mask = mask_ref[0].astype(jnp.float32)     # (1, S)   key mask (1 keep / 0 pad)
    bias = (1.0 - mask) * jnp.float32(-1e9)    # additive attention bias

    S, H = x_all.shape
    NH = attn_ref.shape[1]
    DH = H // NH

    # embedding LayerNorm (row-local, fp32)
    x_all = _layer_norm(x_all, ln0g[...], ln0b[...])
    x_q = _layer_norm(x_q, ln0g[...], ln0b[...])

    # projections: bf16 MXU operands, fp32 accumulation.
    # K and V are fused into one (S,H)x(H,2H) matmul; 1/sqrt(DH) is folded into
    # wq / bq on the host, so no per-element scale pass is needed here.
    kv = jnp.dot(x_all.astype(wkv.dtype), wkv[...],
                 preferred_element_type=jnp.float32) + bkv[...]
    q = jnp.dot(x_q.astype(wq.dtype), wq[...],
                preferred_element_type=jnp.float32) + bq[...]
    k = kv[:, :H]
    v = kv[:, H:]

    # per-head masked-softmax attention.  Per-head contexts are packed into a bf16
    # (TQ, H) VMEM slab so the output projection is ONE full-width K=H matmul.
    for hh in range(NH):
        qh = q[:, hh * DH:(hh + 1) * DH].astype(jnp.bfloat16)
        kh = k[:, hh * DH:(hh + 1) * DH].astype(jnp.bfloat16)
        vh = v[:, hh * DH:(hh + 1) * DH].astype(jnp.bfloat16)
        # scores = q_scaled @ k^T  (contract last dims, no explicit transpose)
        sc = lax.dot_general(qh, kh, (((1,), (1,)), ((), ())),
                             preferred_element_type=jnp.float32) + bias
        m = jnp.max(sc, axis=-1, keepdims=True)
        e = jnp.exp(sc - m)
        p = e * pl.reciprocal(jnp.sum(e, axis=-1, keepdims=True), approx=True)
        attn_ref[0, hh] = p.astype(attn_ref.dtype)
        ctx_scratch[:, hh * DH:(hh + 1) * DH] = jnp.dot(
            p.astype(jnp.bfloat16), vh,
            preferred_element_type=jnp.float32).astype(ctx_scratch.dtype)

    # single full-width output projection (bf16 slab -> bf16 weights, fp32 acc)
    attn_out = jnp.dot(ctx_scratch[...], wo[...],
                       preferred_element_type=jnp.float32) + bo[...]
    h1 = _layer_norm(x_q + attn_out, ln1g[...], ln1b[...])

    # FFN
    ff = jnp.dot(h1.astype(w1.dtype), w1[...],
                 preferred_element_type=jnp.float32) + b1[...]
    ff = _gelu(ff)
    ff = jnp.dot(ff.astype(w2.dtype), w2[...],
                 preferred_element_type=jnp.float32) + b2[...]
    out = _layer_norm(h1 + ff, ln2g[...], ln2b[...])
    out_ref[0] = out.astype(out_ref.dtype)


def pack_params(params, num_heads):
    """One-time host-side weight packing (no per-call casts/concats in the forward)."""
    H = params["wq"].shape[0]
    DH = H // num_heads
    scale = jnp.float32(1.0 / (DH ** 0.5))
    return {
        "word_emb": params["word_emb"],
        "pos_emb": params["pos_emb"],
        "type_emb": params["type_emb"],
        "ln0g": params["ln0g"], "ln0b": params["ln0b"],
        "wq": (params["wq"] * scale).astype(jnp.bfloat16),   # scale folded into Q
        "bq": params["bq"] * scale,
        "wkv": jnp.concatenate([params["wk"], params["wv"]],
                               axis=1).astype(jnp.bfloat16),  # (H, 2H)
        "bkv": jnp.concatenate([params["bk"], params["bv"]], axis=1),
        "wo": params["wo"].astype(jnp.bfloat16), "bo": params["bo"],
        "ln1g": params["ln1g"], "ln1b": params["ln1b"],
        "w1": params["w1"].astype(jnp.bfloat16), "b1": params["b1"],
        "w2": params["w2"].astype(jnp.bfloat16), "b2": params["b2"],
        "ln2g": params["ln2g"], "ln2b": params["ln2b"],
    }


def encoder_forward(input_ids, attention_mask, packed, num_heads, *,
                    tq=None, attn_dtype=jnp.bfloat16):
    """Returns (sequence_output [B,S,H] f32, attention [B,NH,S,S] attn_dtype)."""
    B, S = input_ids.shape
    H = packed["word_emb"].shape[1]
    FF = packed["w1"].shape[1]
    NH = num_heads

    TQ = S if tq is None else int(tq)
    if TQ > S or S % TQ != 0:
        TQ = S
    n_rt = S // TQ

    # ---- glue: embedding lookup (data-dependent gather stays in plain JAX) ----
    # activations handed to the kernel in bf16 (halves the per-step activation DMA)
    x = (packed["word_emb"][input_ids]
         + packed["pos_emb"][None, :S, :]
         + packed["type_emb"][0][None, None, :]).astype(jnp.bfloat16)
    # key mask (B,1,S); the additive bias is built inside the kernel.
    mask = attention_mask.astype(jnp.float32)[:, None, :]

    param_args = [packed["ln0g"], packed["ln0b"],
                  packed["wq"], packed["bq"], packed["wkv"], packed["bkv"],
                  packed["wo"], packed["bo"],
                  packed["ln1g"], packed["ln1b"],
                  packed["w1"], packed["b1"], packed["w2"], packed["b2"],
                  packed["ln2g"], packed["ln2b"]]

    def const_spec(arr):
        # Constant index_map: single-buffer the block (second buffer is pure waste).
        nd = arr.ndim
        idx = lambda b, r, _nd=nd: (0,) * _nd
        try:
            return pl.BlockSpec(arr.shape, idx, pipeline_mode=pl.Buffered(1))
        except TypeError:  # older Pallas without pipeline_mode
            return pl.BlockSpec(arr.shape, idx)

    in_specs = [pl.BlockSpec((1, S, H), lambda b, r: (b, 0, 0)),    # rows for K/V
                pl.BlockSpec((1, TQ, H), lambda b, r: (b, r, 0)),   # query-row tile
                pl.BlockSpec((1, 1, S), lambda b, r: (b, 0, 0))]    # key mask
    in_specs += [const_spec(a) for a in param_args]

    out_specs = [pl.BlockSpec((1, TQ, H), lambda b, r: (b, r, 0)),
                 pl.BlockSpec((1, NH, TQ, S), lambda b, r: (b, 0, r, 0))]
    out_shapes = (jax.ShapeDtypeStruct((B, S, H), jnp.float32),
                  jax.ShapeDtypeStruct((B, NH, S, S), attn_dtype))

    # VMEM budget: single-buffered weights + double-buffered activation/output
    # blocks + scratch, with headroom; clamp below v7x's 64 MiB physical VMEM.
    nbytes = lambda a: int(a.size) * a.dtype.itemsize
    attn_isz = jnp.dtype(attn_dtype).itemsize
    w_bytes = sum(nbytes(a) for a in param_args)
    act_bytes = 2 * (S * H * 2 + TQ * H * 2 + S * 4)
    out_bytes = 2 * (TQ * H * 4 + NH * TQ * S * attn_isz)
    scratch_bytes = TQ * H * 2
    vmem_budget = int(1.5 * (w_bytes + act_bytes + out_bytes + scratch_bytes)) + (4 << 20)
    vmem_budget = max(8 << 20, min(vmem_budget, 48 << 20))

    # advisory cost hint so XLA schedules the surrounding gather/mask prep well
    flops = 2 * B * (S * H * 2 * H + S * H * H      # KV + Q projections
                     + 2 * S * S * H                # scores + context
                     + S * H * H                    # output projection
                     + 2 * S * H * FF)              # FFN
    transcendentals = B * (NH * S * S + NH * S + S * FF + 3 * S)
    bytes_accessed = (w_bytes + B * (2 * S * H * 2 + n_rt * S * 4
                                     + S * H * 4 + NH * S * S * attn_isz))
    cost = pl.CostEstimate(flops=flops, transcendentals=transcendentals,
                           bytes_accessed=bytes_accessed)

    seq_out, attn = pl.pallas_call(
        encoder_layer_kernel,
        out_shape=out_shapes,
        grid_spec=pltpu.PrefetchScalarGridSpec(
            num_scalar_prefetch=0,
            grid=(B, n_rt),
            in_specs=in_specs,
            out_specs=out_specs,
            scratch_shapes=[pltpu.VMEM((TQ, H), jnp.bfloat16)]),
        compiler_params=pltpu.CompilerParams(
            dimension_semantics=("parallel", "parallel"),
            vmem_limit_bytes=vmem_budget),
        cost_estimate=cost,
    )(x, x, mask, *param_args)
    return seq_out, attn


def init_params(key, vocab, max_pos, H, FF):
    keys = jax.random.split(key, 9)
    std = 0.02

    def w(k, shape):
        return jax.random.normal(k, shape, jnp.float32) * std

    p = {}
    p["word_emb"] = w(keys[0], (vocab, H))
    p["pos_emb"] = w(keys[1], (max_pos, H))
    p["type_emb"] = w(keys[2], (2, H))
    p["ln0g"] = jnp.ones((1, H), jnp.float32)
    p["ln0b"] = jnp.zeros((1, H), jnp.float32)
    p["wq"] = w(keys[3], (H, H)); p["bq"] = jnp.zeros((1, H), jnp.float32)
    p["wk"] = w(keys[4], (H, H)); p["bk"] = jnp.zeros((1, H), jnp.float32)
    p["wv"] = w(keys[5], (H, H)); p["bv"] = jnp.zeros((1, H), jnp.float32)
    p["wo"] = w(keys[6], (H, H)); p["bo"] = jnp.zeros((1, H), jnp.float32)
    p["ln1g"] = jnp.ones((1, H), jnp.float32)
    p["ln1b"] = jnp.zeros((1, H), jnp.float32)
    p["w1"] = w(keys[7], (H, FF)); p["b1"] = jnp.zeros((1, FF), jnp.float32)
    p["w2"] = w(keys[8], (FF, H)); p["b2"] = jnp.zeros((1, H), jnp.float32)
    p["ln2g"] = jnp.ones((1, H), jnp.float32)
    p["ln2b"] = jnp.zeros((1, H), jnp.float32)
    return p


if __name__ == "__main__":
    # Small shapes consistent with Encoder.forward's simple path
    # (seq length c=8 <= max_position_embeddings - 2 for roberta).
    B, S, H, NH, FF = 2, 8, 32, 4, 64
    vocab = 100

    key = jax.random.PRNGKey(0)
    kp, kid = jax.random.split(key)
    params = init_params(kp, vocab, max_pos=16, H=H, FF=FF)
    packed = pack_params(params, NH)   # one-time pre-pack (no per-call weight casts)

    input_ids = jax.random.randint(kid, (B, S), 0, vocab, dtype=jnp.int32)
    # second example has two padded positions
    attention_mask = jnp.array([[1] * S, [1] * 6 + [0] * 2], dtype=jnp.float32)

    # TODO(synk): the long-input segmenting branch (c > max_position_embeddings)
    # is host-side python list manipulation over dynamic seq lengths; only the
    # simple (single-segment) path is implemented here.
    fwd = jax.jit(lambda ids, m, pk: encoder_forward(ids, m, pk, NH))
    seq_out, attn = fwd(input_ids, attention_mask, packed)
    jax.block_until_ready((seq_out, attn))

    assert seq_out.shape == (B, S, H) and seq_out.dtype == jnp.float32
    assert attn.shape == (B, NH, S, S)
    # softmax rows must sum to 1 (keys are masked, queries are not); bf16 probs +
    # approx reciprocal contribute a few 1e-3 of error.
    rows = attn.astype(jnp.float32).sum(-1)
    assert bool(jnp.allclose(rows, 1.0, atol=1e-2))
    # padded keys get ~zero probability
    assert float(jnp.max(attn.astype(jnp.float32)[1, :, :, 6:])) < 1e-3
    print("KERNEL_OK")
</pallas_src>

<mosaic_0001>
module attributes {stable_mosaic.version = 11 : i64} {
  func.func @encoder_layer_kernel(%arg0: i32, %arg1: i32, %arg2: memref<1x8x32xbf16, #tpu.memory_space<vmem>>, %arg3: memref<1x8x32xbf16, #tpu.memory_space<vmem>>, %arg4: memref<1x1x8xf32, #tpu.memory_space<vmem>>, %arg5: memref<1x32xf32, #tpu.memory_space<vmem>>, %arg6: memref<1x32xf32, #tpu.memory_space<vmem>>, %arg7: memref<32x32xbf16, #tpu.memory_space<vmem>>, %arg8: memref<1x32xf32, #tpu.memory_space<vmem>>, %arg9: memref<32x64xbf16, #tpu.memory_space<vmem>>, %arg10: memref<1x64xf32, #tpu.memory_space<vmem>>, %arg11: memref<32x32xbf16, #tpu.memory_space<vmem>>, %arg12: memref<1x32xf32, #tpu.memory_space<vmem>>, %arg13: memref<1x32xf32, #tpu.memory_space<vmem>>, %arg14: memref<1x32xf32, #tpu.memory_space<vmem>>, %arg15: memref<32x64xbf16, #tpu.memory_space<vmem>>, %arg16: memref<1x64xf32, #tpu.memory_space<vmem>>, %arg17: memref<64x32xbf16, #tpu.memory_space<vmem>>, %arg18: memref<1x32xf32, #tpu.memory_space<vmem>>, %arg19: memref<1x32xf32, #tpu.memory_space<vmem>>, %arg20: memref<1x32xf32, #tpu.memory_space<vmem>>, %arg21: memref<1x8x32xf32, #tpu.memory_space<vmem>>, %arg22: memref<1x4x8x8xbf16, #tpu.memory_space<vmem>>, %arg23: memref<8x32xbf16, #tpu.memory_space<vmem>>) attributes {dimension_semantics = [#tpu.dimension_semantics<parallel>, #tpu.dimension_semantics<parallel>], iteration_bounds = array<i64: 2, 1>, scalar_prefetch = 0 : i64, scratch_operands = 1 : i64, tpu.core_type = #tpu.core_type<tc>, window_params = [{transform_indices = @transform_0, window_bounds = array<i64: 1, 8, 32>}, {transform_indices = @transform_1, window_bounds = array<i64: 1, 8, 32>}, {transform_indices = @transform_2, window_bounds = array<i64: 1, 1, 8>}, {pipeline_mode = #tpu.pipeline_mode<synchronous>, transform_indices = @transform_3, window_bounds = array<i64: 1, 32>}, {pipeline_mode = #tpu.pipeline_mode<synchronous>, transform_indices = @transform_4, window_bounds = array<i64: 1, 32>}, {pipeline_mode = #tpu.pipeline_mode<synchronous>, transform_indices = @transform_5, window_bounds = array<i64: 32, 32>}, {pipeline_mode = #tpu.pipeline_mode<synchronous>, transform_indices = @transform_6, window_bounds = array<i64: 1, 32>}, {pipeline_mode = #tpu.pipeline_mode<synchronous>, transform_indices = @transform_7, window_bounds = array<i64: 32, 64>}, {pipeline_mode = #tpu.pipeline_mode<synchronous>, transform_indices = @transform_8, window_bounds = array<i64: 1, 64>}, {pipeline_mode = #tpu.pipeline_mode<synchronous>, transform_indices = @transform_9, window_bounds = array<i64: 32, 32>}, {pipeline_mode = #tpu.pipeline_mode<synchronous>, transform_indices = @transform_10, window_bounds = array<i64: 1, 32>}, {pipeline_mode = #tpu.pipeline_mode<synchronous>, transform_indices = @transform_11, window_bounds = array<i64: 1, 32>}, {pipeline_mode = #tpu.pipeline_mode<synchronous>, transform_indices = @transform_12, window_bounds = array<i64: 1, 32>}, {pipeline_mode = #tpu.pipeline_mode<synchronous>, transform_indices = @transform_13, window_bounds = array<i64: 32, 64>}, {pipeline_mode = #tpu.pipeline_mode<synchronous>, transform_indices = @transform_14, window_bounds = array<i64: 1, 64>}, {pipeline_mode = #tpu.pipeline_mode<synchronous>, transform_indices = @transform_15, window_bounds = array<i64: 64, 32>}, {pipeline_mode = #tpu.pipeline_mode<synchronous>, transform_indices = @transform_16, window_bounds = array<i64: 1, 32>}, {pipeline_mode = #tpu.pipeline_mode<synchronous>, transform_indices = @transform_17, window_bounds = array<i64: 1, 32>}, {pipeline_mode = #tpu.pipeline_mode<synchronous>, transform_indices = @transform_18, window_bounds = array<i64: 1, 32>}, {transform_indices = @transform_19, window_bounds = array<i64: 1, 8, 32>}, {transform_indices = @transform_20, window_bounds = array<i64: 1, 4, 8, 8>}]} {
    %c0 = arith.constant 0 : index
    %c0_0 = arith.constant 0 : index
    %c0_1 = arith.constant 0 : index
    %0 = vector.load %arg2[%c0, %c0_0, %c0_1] : memref<1x8x32xbf16, #tpu.memory_space<vmem>>, vector<1x8x32xbf16>
    %1 = vector.shape_cast %0 : vector<1x8x32xbf16> to vector<8x32xbf16>
    %2 = arith.extf %1 : vector<8x32xbf16> to vector<8x32xf32>
    %c0_2 = arith.constant 0 : index
    %c0_3 = arith.constant 0 : index
    %c0_4 = arith.constant 0 : index
    %3 = vector.load %arg3[%c0_2, %c0_3, %c0_4] : memref<1x8x32xbf16, #tpu.memory_space<vmem>>, vector<1x8x32xbf16>
    %4 = vector.shape_cast %3 : vector<1x8x32xbf16> to vector<8x32xbf16>
    %5 = arith.extf %4 : vector<8x32xbf16> to vector<8x32xf32>
    %c0_5 = arith.constant 0 : index
    %c0_6 = arith.constant 0 : index
    %c0_7 = arith.constant 0 : index
    %6 = vector.load %arg4[%c0_5, %c0_6, %c0_7] : memref<1x1x8xf32, #tpu.memory_space<vmem>>, vector<1x1x8xf32>
    %7 = vector.shape_cast %6 : vector<1x1x8xf32> to vector<1x8xf32>
    %cst = arith.constant 1.000000e+00 : f32
    %8 = vector.broadcast %cst : f32 to vector<1x8xf32>
    %9 = arith.subf %8, %7 : vector<1x8xf32>
    %cst_8 = arith.constant -1.000000e+09 : f32
    %10 = vector.broadcast %cst_8 : f32 to vector<1x8xf32>
    %11 = arith.mulf %9, %10 : vector<1x8xf32>
    %c0_9 = arith.constant 0 : index
    %c0_10 = arith.constant 0 : index
    %12 = vector.load %arg5[%c0_9, %c0_10] : memref<1x32xf32, #tpu.memory_space<vmem>>, vector<1x32xf32>
    %c0_11 = arith.constant 0 : index
    %c0_12 = arith.constant 0 : index
    %13 = vector.load %arg6[%c0_11, %c0_12] : memref<1x32xf32, #tpu.memory_space<vmem>>, vector<1x32xf32>
    %cst_13 = arith.constant dense<0.000000e+00> : vector<8xf32>
    %14 = vector.multi_reduction <add>, %2, %cst_13 [1] : vector<8x32xf32> to vector<8xf32>
    %15 = vector.shape_cast %14 : vector<8xf32> to vector<8x1xf32>
    %cst_14 = arith.constant 3.200000e+01 : f32
    %16 = vector.broadcast %cst_14 : f32 to vector<8x1xf32>
    %17 = arith.divf %15, %16 : vector<8x1xf32>
    %18 = vector.broadcast %17 : vector<8x1xf32> to vector<8x32xf32>
    %19 = arith.subf %2, %18 : vector<8x32xf32>
    %20 = arith.mulf %19, %19 : vector<8x32xf32>
    %cst_15 = arith.constant dense<0.000000e+00> : vector<8xf32>
    %21 = vector.multi_reduction <add>, %20, %cst_15 [1] : vector<8x32xf32> to vector<8xf32>
    %22 = vector.shape_cast %21 : vector<8xf32> to vector<8x1xf32>
    %cst_16 = arith.constant 3.200000e+01 : f32
    %23 = vector.broadcast %cst_16 : f32 to vector<8x1xf32>
    %24 = arith.divf %22, %23 : vector<8x1xf32>
    %25 = vector.broadcast %17 : vector<8x1xf32> to vector<8x32xf32>
    %26 = arith.subf %2, %25 : vector<8x32xf32>
    %cst_17 = arith.constant 9.99999996E-13 : f32
    %27 = vector.broadcast %cst_17 : f32 to vector<8x1xf32>
    %28 = arith.addf %24, %27 : vector<8x1xf32>
    %29 = math.rsqrt %28 : vector<8x1xf32>
    %30 = vector.broadcast %29 : vector<8x1xf32> to vector<8x32xf32>
    %31 = arith.mulf %26, %30 : vector<8x32xf32>
    %32 = vector.broadcast %12 : vector<1x32xf32> to vector<8x32xf32>
    %33 = arith.mulf %31, %32 : vector<8x32xf32>
    %34 = vector.broadcast %13 : vector<1x32xf32> to vector<8x32xf32>
    %35 = arith.addf %33, %34 : vector<8x32xf32>
    %c0_18 = arith.constant 0 : index
    %c0_19 = arith.constant 0 : index
    %36 = vector.load %arg5[%c0_18, %c0_19] : memref<1x32xf32, #tpu.memory_space<vmem>>, vector<1x32xf32>
    %c0_20 = arith.constant 0 : index
    %c0_21 = arith.constant 0 : index
    %37 = vector.load %arg6[%c0_20, %c0_21] : memref<1x32xf32, #tpu.memory_space<vmem>>, vector<1x32xf32>
    %cst_22 = arith.constant dense<0.000000e+00> : vector<8xf32>
    %38 = vector.multi_reduction <add>, %5, %cst_22 [1] : vector<8x32xf32> to vector<8xf32>
    %39 = vector.shape_cast %38 : vector<8xf32> to vector<8x1xf32>
    %cst_23 = arith.constant 3.200000e+01 : f32
    %40 = vector.broadcast %cst_23 : f32 to vector<8x1xf32>
    %41 = arith.divf %39, %40 : vector<8x1xf32>
    %42 = vector.broadcast %41 : vector<8x1xf32> to vector<8x32xf32>
    %43 = arith.subf %5, %42 : vector<8x32xf32>
    %44 = arith.mulf %43, %43 : vector<8x32xf32>
    %cst_24 = arith.constant dense<0.000000e+00> : vector<8xf32>
    %45 = vector.multi_reduction <add>, %44, %cst_24 [1] : vector<8x32xf32> to vector<8xf32>
    %46 = vector.shape_cast %45 : vector<8xf32> to vector<8x1xf32>
    %cst_25 = arith.constant 3.200000e+01 : f32
    %47 = vector.broadcast %cst_25 : f32 to vector<8x1xf32>
    %48 = arith.divf %46, %47 : vector<8x1xf32>
    %49 = vector.broadcast %41 : vector<8x1xf32> to vector<8x32xf32>
    %50 = arith.subf %5, %49 : vector<8x32xf32>
    %cst_26 = arith.constant 9.99999996E-13 : f32
    %51 = vector.broadcast %cst_26 : f32 to vector<8x1xf32>
    %52 = arith.addf %48, %51 : vector<8x1xf32>
    %53 = math.rsqrt %52 : vector<8x1xf32>
    %54 = vector.broadcast %53 : vector<8x1xf32> to vector<8x32xf32>
    %55 = arith.mulf %50, %54 : vector<8x32xf32>
    %56 = vector.broadcast %36 : vector<1x32xf32> to vector<8x32xf32>
    %57 = arith.mulf %55, %56 : vector<8x32xf32>
    %58 = vector.broadcast %37 : vector<1x32xf32> to vector<8x32xf32>
    %59 = arith.addf %57, %58 : vector<8x32xf32>
    %60 = arith.truncf %35 : vector<8x32xf32> to vector<8x32xbf16>
    %c0_27 = arith.constant 0 : index
    %c0_28 = arith.constant 0 : index
    %61 = vector.load %arg9[%c0_27, %c0_28] : memref<32x64xbf16, #tpu.memory_space<vmem>>, vector<32x64xbf16>
    %cst_29 = arith.constant dense<0.000000e+00> : vector<8x64xf32>
    %62 = tpu.matmul %60, %61, %cst_29 {dimension_numbers = #tpu.dot_dimension_numbers<[1], [0], [0], [1], [0, 0, 1, 1], [], []>} : vector<8x32xbf16>, vector<32x64xbf16>, vector<8x64xf32> -> vector<8x64xf32>
    %c0_30 = arith.constant 0 : index
    %c0_31 = arith.constant 0 : index
    %63 = vector.load %arg10[%c0_30, %c0_31] : memref<1x64xf32, #tpu.memory_space<vmem>>, vector<1x64xf32>
    %64 = vector.broadcast %63 : vector<1x64xf32> to vector<8x64xf32>
    %65 = arith.addf %62, %64 : vector<8x64xf32>
    %66 = arith.truncf %59 : vector<8x32xf32> to vector<8x32xbf16>
    %c0_32 = arith.constant 0 : index
    %c0_33 = arith.constant 0 : index
    %67 = vector.load %arg7[%c0_32, %c0_33] : memref<32x32xbf16, #tpu.memory_space<vmem>>, vector<32x32xbf16>
    %cst_34 = arith.constant dense<0.000000e+00> : vector<8x32xf32>
    %68 = tpu.matmul %66, %67, %cst_34 {dimension_numbers = #tpu.dot_dimension_numbers<[1], [0], [0], [1], [0, 0, 1, 1], [], []>} : vector<8x32xbf16>, vector<32x32xbf16>, vector<8x32xf32> -> vector<8x32xf32>
    %c0_35 = arith.constant 0 : index
    %c0_36 = arith.constant 0 : index
    %69 = vector.load %arg8[%c0_35, %c0_36] : memref<1x32xf32, #tpu.memory_space<vmem>>, vector<1x32xf32>
    %70 = vector.broadcast %69 : vector<1x32xf32> to vector<8x32xf32>
    %71 = arith.addf %68, %70 : vector<8x32xf32>
    %72 = vector.extract_strided_slice %65 {offsets = [0, 0], sizes = [8, 32], strides = [1, 1]} : vector<8x64xf32> to vector<8x32xf32>
    %73 = vector.extract_strided_slice %65 {offsets = [0, 32], sizes = [8, 32], strides = [1, 1]} : vector<8x64xf32> to vector<8x32xf32>
    %74 = vector.extract_strided_slice %71 {offsets = [0, 0], sizes = [8, 8], strides = [1, 1]} : vector<8x32xf32> to vector<8x8xf32>
    %75 = arith.truncf %74 : vector<8x8xf32> to vector<8x8xbf16>
    %76 = vector.extract_strided_slice %72 {offsets = [0, 0], sizes = [8, 8], strides = [1, 1]} : vector<8x32xf32> to vector<8x8xf32>
    %77 = arith.truncf %76 : vector<8x8xf32> to vector<8x8xbf16>
    %78 = vector.extract_strided_slice %73 {offsets = [0, 0], sizes = [8, 8], strides = [1, 1]} : vector<8x32xf32> to vector<8x8xf32>
    %79 = arith.truncf %78 : vector<8x8xf32> to vector<8x8xbf16>
    %cst_37 = arith.constant dense<0.000000e+00> : vector<8x8xf32>
    %80 = tpu.matmul %75, %77, %cst_37 {dimension_numbers = #tpu.dot_dimension_numbers<[1], [1], [0], [0], [0, 0, 1, 0], [], []>} : vector<8x8xbf16>, vector<8x8xbf16>, vector<8x8xf32> -> vector<8x8xf32>
    %81 = vector.broadcast %11 : vector<1x8xf32> to vector<8x8xf32>
    %82 = arith.addf %80, %81 : vector<8x8xf32>
    %cst_38 = arith.constant dense<0xFF800000> : vector<8xf32>
    %83 = vector.multi_reduction <maximumf>, %82, %cst_38 [1] : vector<8x8xf32> to vector<8xf32>
    %84 = vector.shape_cast %83 : vector<8xf32> to vector<8x1xf32>
    %85 = vector.broadcast %84 : vector<8x1xf32> to vector<8x8xf32>
    %86 = arith.subf %82, %85 : vector<8x8xf32>
    %87 = math.exp %86 : vector<8x8xf32>
    %cst_39 = arith.constant dense<0.000000e+00> : vector<8xf32>
    %88 = vector.multi_reduction <add>, %87, %cst_39 [1] : vector<8x8xf32> to vector<8xf32>
    %89 = vector.shape_cast %88 : vector<8xf32> to vector<8x1xf32>
    %90 = tpu.reciprocal %89 {approx = true} : vector<8x1xf32> -> vector<8x1xf32>
    %91 = vector.broadcast %90 : vector<8x1xf32> to vector<8x8xf32>
    %92 = arith.mulf %87, %91 : vector<8x8xf32>
    %93 = arith.truncf %92 : vector<8x8xf32> to vector<8x8xbf16>
    %c0_40 = arith.constant 0 : index
    %c0_41 = arith.constant 0 : index
    %c0_42 = arith.constant 0 : index
    %c0_43 = arith.constant 0 : index
    %94 = vector.load %arg22[%c0_40, %c0_41, %c0_42, %c0_43] : memref<1x4x8x8xbf16, #tpu.memory_space<vmem>>, vector<1x1x8x8xbf16>
    %95 = vector.shape_cast %94 : vector<1x1x8x8xbf16> to vector<8x8xbf16>
    %96 = vector.shape_cast %93 : vector<8x8xbf16> to vector<1x1x8x8xbf16>
    tpu.vector_store %arg22[%c0_40, %c0_41, %c0_42, %c0_43], %96 {strides = array<i32>} : memref<1x4x8x8xbf16, #tpu.memory_space<vmem>>, vector<1x1x8x8xbf16>,
    %97 = arith.truncf %92 : vector<8x8xf32> to vector<8x8xbf16>
    %cst_44 = arith.constant dense<0.000000e+00> : vector<8x8xf32>
    %98 = tpu.matmul %97, %79, %cst_44 {dimension_numbers = #tpu.dot_dimension_numbers<[1], [0], [0], [1], [0, 0, 1, 1], [], []>} : vector<8x8xbf16>, vector<8x8xbf16>, vector<8x8xf32> -> vector<8x8xf32>
    %99 = arith.truncf %98 : vector<8x8xf32> to vector<8x8xbf16>
    %c0_45 = arith.constant 0 : index
    %c0_46 = arith.constant 0 : index
    %100 = vector.load %arg23[%c0_45, %c0_46] : memref<8x32xbf16, #tpu.memory_space<vmem>>, vector<8x8xbf16>
    tpu.vector_store %arg23[%c0_45, %c0_46], %99 {strides = array<i32>} : memref<8x32xbf16, #tpu.memory_space<vmem>>, vector<8x8xbf16>,
    %101 = vector.extract_strided_slice %71 {offsets = [0, 8], sizes = [8, 8], strides = [1, 1]} : vector<8x32xf32> to vector<8x8xf32>
    %102 = arith.truncf %101 : vector<8x8xf32> to vector<8x8xbf16>
    %103 = vector.extract_strided_slice %72 {offsets = [0, 8], sizes = [8, 8], strides = [1, 1]} : vector<8x32xf32> to vector<8x8xf32>
    %104 = arith.truncf %103 : vector<8x8xf32> to vector<8x8xbf16>
    %105 = vector.extract_strided_slice %73 {offsets = [0, 8], sizes = [8, 8], strides = [1, 1]} : vector<8x32xf32> to vector<8x8xf32>
    %106 = arith.truncf %105 : vector<8x8xf32> to vector<8x8xbf16>
    %cst_47 = arith.constant dense<0.000000e+00> : vector<8x8xf32>
    %107 = tpu.matmul %102, %104, %cst_47 {dimension_numbers = #tpu.dot_dimension_numbers<[1], [1], [0], [0], [0, 0, 1, 0], [], []>} : vector<8x8xbf16>, vector<8x8xbf16>, vector<8x8xf32> -> vector<8x8xf32>
    %108 = vector.broadcast %11 : vector<1x8xf32> to vector<8x8xf32>
    %109 = arith.addf %107, %108 : vector<8x8xf32>
    %cst_48 = arith.constant dense<0xFF800000> : vector<8xf32>
    %110 = vector.multi_reduction <maximumf>, %109, %cst_48 [1] : vector<8x8xf32> to vector<8xf32>
    %111 = vector.shape_cast %110 : vector<8xf32> to vector<8x1xf32>
    %112 = vector.broadcast %111 : vector<8x1xf32> to vector<8x8xf32>
    %113 = arith.subf %109, %112 : vector<8x8xf32>
    %114 = math.exp %113 : vector<8x8xf32>
    %cst_49 = arith.constant dense<0.000000e+00> : vector<8xf32>
    %115 = vector.multi_reduction <add>, %114, %cst_49 [1] : vector<8x8xf32> to vector<8xf32>
    %116 = vector.shape_cast %115 : vector<8xf32> to vector<8x1xf32>
    %117 = tpu.reciprocal %116 {approx = true} : vector<8x1xf32> -> vector<8x1xf32>
    %118 = vector.broadcast %117 : vector<8x1xf32> to vector<8x8xf32>
    %119 = arith.mulf %114, %118 : vector<8x8xf32>
    %120 = arith.truncf %119 : vector<8x8xf32> to vector<8x8xbf16>
    %c0_50 = arith.constant 0 : index
    %c1 = arith.constant 1 : index
    %c0_51 = arith.constant 0 : index
    %c0_52 = arith.constant 0 : index
    %121 = vector.load %arg22[%c0_50, %c1, %c0_51, %c0_52] : memref<1x4x8x8xbf16, #tpu.memory_space<vmem>>, vector<1x1x8x8xbf16>
    %122 = vector.shape_cast %121 : vector<1x1x8x8xbf16> to vector<8x8xbf16>
    %123 = vector.shape_cast %120 : vector<8x8xbf16> to vector<1x1x8x8xbf16>
    tpu.vector_store %arg22[%c0_50, %c1, %c0_51, %c0_52], %123 {strides = array<i32>} : memref<1x4x8x8xbf16, #tpu.memory_space<vmem>>, vector<1x1x8x8xbf16>,
    %124 = arith.truncf %119 : vector<8x8xf32> to vector<8x8xbf16>
    %cst_53 = arith.constant dense<0.000000e+00> : vector<8x8xf32>
    %125 = tpu.matmul %124, %106, %cst_53 {dimension_numbers = #tpu.dot_dimension_numbers<[1], [0], [0], [1], [0, 0, 1, 1], [], []>} : vector<8x8xbf16>, vector<8x8xbf16>, vector<8x8xf32> -> vector<8x8xf32>
    %126 = arith.truncf %125 : vector<8x8xf32> to vector<8x8xbf16>
    %c0_54 = arith.constant 0 : index
    %c8 = arith.constant 8 : index
    %127 = vector.load %arg23[%c0_54, %c8] : memref<8x32xbf16, #tpu.memory_space<vmem>>, vector<8x8xbf16>
    tpu.vector_store %arg23[%c0_54, %c8], %126 {strides = array<i32>} : memref<8x32xbf16, #tpu.memory_space<vmem>>, vector<8x8xbf16>,
    %128 = vector.extract_strided_slice %71 {offsets = [0, 16], sizes = [8, 8], strides = [1, 1]} : vector<8x32xf32> to vector<8x8xf32>
    %129 = arith.truncf %128 : vector<8x8xf32> to vector<8x8xbf16>
    %130 = vector.extract_strided_slice %72 {offsets = [0, 16], sizes = [8, 8], strides = [1, 1]} : vector<8x32xf32> to vector<8x8xf32>
    %131 = arith.truncf %130 : vector<8x8xf32> to vector<8x8xbf16>
    %132 = vector.extract_strided_slice %73 {offsets = [0, 16], sizes = [8, 8], strides = [1, 1]} : vector<8x32xf32> to vector<8x8xf32>
    %133 = arith.truncf %132 : vector<8x8xf32> to vector<8x8xbf16>
    %cst_55 = arith.constant dense<0.000000e+00> : vector<8x8xf32>
    %134 = tpu.matmul %129, %131, %cst_55 {dimension_numbers = #tpu.dot_dimension_numbers<[1], [1], [0], [0], [0, 0, 1, 0], [], []>} : vector<8x8xbf16>, vector<8x8xbf16>, vector<8x8xf32> -> vector<8x8xf32>
    %135 = vector.broadcast %11 : vector<1x8xf32> to vector<8x8xf32>
    %136 = arith.addf %134, %135 : vector<8x8xf32>
    %cst_56 = arith.constant dense<0xFF800000> : vector<8xf32>
    %137 = vector.multi_reduction <maximumf>, %136, %cst_56 [1] : vector<8x8xf32> to vector<8xf32>
    %138 = vector.shape_cast %137 : vector<8xf32> to vector<8x1xf32>
    %139 = vector.broadcast %138 : vector<8x1xf32> to vector<8x8xf32>
    %140 = arith.subf %136, %139 : vector<8x8xf32>
    %141 = math.exp %140 : vector<8x8xf32>
    %cst_57 = arith.constant dense<0.000000e+00> : vector<8xf32>
    %142 = vector.multi_reduction <add>, %141, %cst_57 [1] : vector<8x8xf32> to vector<8xf32>
    %143 = vector.shape_cast %142 : vector<8xf32> to vector<8x1xf32>
    %144 = tpu.reciprocal %143 {approx = true} : vector<8x1xf32> -> vector<8x1xf32>
    %145 = vector.broadcast %144 : vector<8x1xf32> to vector<8x8xf32>
    %146 = arith.mulf %141, %145 : vector<8x8xf32>
    %147 = arith.truncf %146 : vector<8x8xf32> to vector<8x8xbf16>
    %c0_58 = arith.constant 0 : index
    %c2 = arith.constant 2 : index
    %c0_59 = arith.constant 0 : index
    %c0_60 = arith.constant 0 : index
    %148 = vector.load %arg22[%c0_58, %c2, %c0_59, %c0_60] : memref<1x4x8x8xbf16, #tpu.memory_space<vmem>>, vector<1x1x8x8xbf16>
    %149 = vector.shape_cast %148 : vector<1x1x8x8xbf16> to vector<8x8xbf16>
    %150 = vector.shape_cast %147 : vector<8x8xbf16> to vector<1x1x8x8xbf16>
    tpu.vector_store %arg22[%c0_58, %c2, %c0_59, %c0_60], %150 {strides = array<i32>} : memref<1x4x8x8xbf16, #tpu.memory_space<vmem>>, vector<1x1x8x8xbf16>,
    %151 = arith.truncf %146 : vector<8x8xf32> to vector<8x8xbf16>
    %cst_61 = arith.constant dense<0.000000e+00> : vector<8x8xf32>
    %152 = tpu.matmul %151, %133, %cst_61 {dimension_numbers = #tpu.dot_dimension_numbers<[1], [0], [0], [1], [0, 0, 1, 1], [], []>} : vector<8x8xbf16>, vector<8x8xbf16>, vector<8x8xf32> -> vector<8x8xf32>
    %153 = arith.truncf %152 : vector<8x8xf32> to vector<8x8xbf16>
    %c0_62 = arith.constant 0 : index
    %c16 = arith.constant 16 : index
    %154 = vector.load %arg23[%c0_62, %c16] : memref<8x32xbf16, #tpu.memory_space<vmem>>, vector<8x8xbf16>
    tpu.vector_store %arg23[%c0_62, %c16], %153 {strides = array<i32>} : memref<8x32xbf16, #tpu.memory_space<vmem>>, vector<8x8xbf16>,
    %155 = vector.extract_strided_slice %71 {offsets = [0, 24], sizes = [8, 8], strides = [1, 1]} : vector<8x32xf32> to vector<8x8xf32>
    %156 = arith.truncf %155 : vector<8x8xf32> to vector<8x8xbf16>
    %157 = vector.extract_strided_slice %72 {offsets = [0, 24], sizes = [8, 8], strides = [1, 1]} : vector<8x32xf32> to vector<8x8xf32>
    %158 = arith.truncf %157 : vector<8x8xf32> to vector<8x8xbf16>
    %159 = vector.extract_strided_slice %73 {offsets = [0, 24], sizes = [8, 8], strides = [1, 1]} : vector<8x32xf32> to vector<8x8xf32>
    %160 = arith.truncf %159 : vector<8x8xf32> to vector<8x8xbf16>
    %cst_63 = arith.constant dense<0.000000e+00> : vector<8x8xf32>
    %161 = tpu.matmul %156, %158, %cst_63 {dimension_numbers = #tpu.dot_dimension_numbers<[1], [1], [0], [0], [0, 0, 1, 0], [], []>} : vector<8x8xbf16>, vector<8x8xbf16>, vector<8x8xf32> -> vector<8x8xf32>
    %162 = vector.broadcast %11 : vector<1x8xf32> to vector<8x8xf32>
    %163 = arith.addf %161, %162 : vector<8x8xf32>
    %cst_64 = arith.constant dense<0xFF800000> : vector<8xf32>
    %164 = vector.multi_reduction <maximumf>, %163, %cst_64 [1] : vector<8x8xf32> to vector<8xf32>
    %165 = vector.shape_cast %164 : vector<8xf32> to vector<8x1xf32>
    %166 = vector.broadcast %165 : vector<8x1xf32> to vector<8x8xf32>
    %167 = arith.subf %163, %166 : vector<8x8xf32>
    %168 = math.exp %167 : vector<8x8xf32>
    %cst_65 = arith.constant dense<0.000000e+00> : vector<8xf32>
    %169 = vector.multi_reduction <add>, %168, %cst_65 [1] : vector<8x8xf32> to vector<8xf32>
    %170 = vector.shape_cast %169 : vector<8xf32> to vector<8x1xf32>
    %171 = tpu.reciprocal %170 {approx = true} : vector<8x1xf32> -> vector<8x1xf32>
    %172 = vector.broadcast %171 : vector<8x1xf32> to vector<8x8xf32>
    %173 = arith.mulf %168, %172 : vector<8x8xf32>
    %174 = arith.truncf %173 : vector<8x8xf32> to vector<8x8xbf16>
    %c0_66 = arith.constant 0 : index
    %c3 = arith.constant 3 : index
    %c0_67 = arith.constant 0 : index
    %c0_68 = arith.constant 0 : index
    %175 = vector.load %arg22[%c0_66, %c3, %c0_67, %c0_68] : memref<1x4x8x8xbf16, #tpu.memory_space<vmem>>, vector<1x1x8x8xbf16>
    %176 = vector.shape_cast %175 : vector<1x1x8x8xbf16> to vector<8x8xbf16>
    %177 = vector.shape_cast %174 : vector<8x8xbf16> to vector<1x1x8x8xbf16>
    tpu.vector_store %arg22[%c0_66, %c3, %c0_67, %c0_68], %177 {strides = array<i32>} : memref<1x4x8x8xbf16, #tpu.memory_space<vmem>>, vector<1x1x8x8xbf16>,
    %178 = arith.truncf %173 : vector<8x8xf32> to vector<8x8xbf16>
    %cst_69 = arith.constant dense<0.000000e+00> : vector<8x8xf32>
    %179 = tpu.matmul %178, %160, %cst_69 {dimension_numbers = #tpu.dot_dimension_numbers<[1], [0], [0], [1], [0, 0, 1, 1], [], []>} : vector<8x8xbf16>, vector<8x8xbf16>, vector<8x8xf32> -> vector<8x8xf32>
    %180 = arith.truncf %179 : vector<8x8xf32> to vector<8x8xbf16>
    %c0_70 = arith.constant 0 : index
    %c24 = arith.constant 24 : index
    %181 = vector.load %arg23[%c0_70, %c24] : memref<8x32xbf16, #tpu.memory_space<vmem>>, vector<8x8xbf16>
    tpu.vector_store %arg23[%c0_70, %c24], %180 {strides = array<i32>} : memref<8x32xbf16, #tpu.memory_space<vmem>>, vector<8x8xbf16>,
    %c0_71 = arith.constant 0 : index
    %c0_72 = arith.constant 0 : index
    %182 = vector.load %arg23[%c0_71, %c0_72] : memref<8x32xbf16, #tpu.memory_space<vmem>>, vector<8x32xbf16>
    %c0_73 = arith.constant 0 : index
    %c0_74 = arith.constant 0 : index
    %183 = vector.load %arg11[%c0_73, %c0_74] : memref<32x32xbf16, #tpu.memory_space<vmem>>, vector<32x32xbf16>
    %cst_75 = arith.constant dense<0.000000e+00> : vector<8x32xf32>
    %184 = tpu.matmul %182, %183, %cst_75 {dimension_numbers = #tpu.dot_dimension_numbers<[1], [0], [0], [1], [0, 0, 1, 1], [], []>} : vector<8x32xbf16>, vector<32x32xbf16>, vector<8x32xf32> -> vector<8x32xf32>
    %c0_76 = arith.constant 0 : index
    %c0_77 = arith.constant 0 : index
    %185 = vector.load %arg12[%c0_76, %c0_77] : memref<1x32xf32, #tpu.memory_space<vmem>>, vector<1x32xf32>
    %186 = vector.broadcast %185 : vector<1x32xf32> to vector<8x32xf32>
    %187 = arith.addf %184, %186 : vector<8x32xf32>
    %188 = arith.addf %59, %187 : vector<8x32xf32>
    %c0_78 = arith.constant 0 : index
    %c0_79 = arith.constant 0 : index
    %189 = vector.load %arg13[%c0_78, %c0_79] : memref<1x32xf32, #tpu.memory_space<vmem>>, vector<1x32xf32>
    %c0_80 = arith.constant 0 : index
    %c0_81 = arith.constant 0 : index
    %190 = vector.load %arg14[%c0_80, %c0_81] : memref<1x32xf32, #tpu.memory_space<vmem>>, vector<1x32xf32>
    %cst_82 = arith.constant dense<0.000000e+00> : vector<8xf32>
    %191 = vector.multi_reduction <add>, %188, %cst_82 [1] : vector<8x32xf32> to vector<8xf32>
    %192 = vector.shape_cast %191 : vector<8xf32> to vector<8x1xf32>
    %cst_83 = arith.constant 3.200000e+01 : f32
    %193 = vector.broadcast %cst_83 : f32 to vector<8x1xf32>
    %194 = arith.divf %192, %193 : vector<8x1xf32>
    %195 = vector.broadcast %194 : vector<8x1xf32> to vector<8x32xf32>
    %196 = arith.subf %188, %195 : vector<8x32xf32>
    %197 = arith.mulf %196, %196 : vector<8x32xf32>
    %cst_84 = arith.constant dense<0.000000e+00> : vector<8xf32>
    %198 = vector.multi_reduction <add>, %197, %cst_84 [1] : vector<8x32xf32> to vector<8xf32>
    %199 = vector.shape_cast %198 : vector<8xf32> to vector<8x1xf32>
    %cst_85 = arith.constant 3.200000e+01 : f32
    %200 = vector.broadcast %cst_85 : f32 to vector<8x1xf32>
    %201 = arith.divf %199, %200 : vector<8x1xf32>
    %202 = vector.broadcast %194 : vector<8x1xf32> to vector<8x32xf32>
    %203 = arith.subf %188, %202 : vector<8x32xf32>
    %cst_86 = arith.constant 9.99999996E-13 : f32
    %204 = vector.broadcast %cst_86 : f32 to vector<8x1xf32>
    %205 = arith.addf %201, %204 : vector<8x1xf32>
    %206 = math.rsqrt %205 : vector<8x1xf32>
    %207 = vector.broadcast %206 : vector<8x1xf32> to vector<8x32xf32>
    %208 = arith.mulf %203, %207 : vector<8x32xf32>
    %209 = vector.broadcast %189 : vector<1x32xf32> to vector<8x32xf32>
    %210 = arith.mulf %208, %209 : vector<8x32xf32>
    %211 = vector.broadcast %190 : vector<1x32xf32> to vector<8x32xf32>
    %212 = arith.addf %210, %211 : vector<8x32xf32>
    %213 = arith.truncf %212 : vector<8x32xf32> to vector<8x32xbf16>
    %c0_87 = arith.constant 0 : index
    %c0_88 = arith.constant 0 : index
    %214 = vector.load %arg15[%c0_87, %c0_88] : memref<32x64xbf16, #tpu.memory_space<vmem>>, vector<32x64xbf16>
    %cst_89 = arith.constant dense<0.000000e+00> : vector<8x64xf32>
    %215 = tpu.matmul %213, %214, %cst_89 {dimension_numbers = #tpu.dot_dimension_numbers<[1], [0], [0], [1], [0, 0, 1, 1], [], []>} : vector<8x32xbf16>, vector<32x64xbf16>, vector<8x64xf32> -> vector<8x64xf32>
    %c0_90 = arith.constant 0 : index
    %c0_91 = arith.constant 0 : index
    %216 = vector.load %arg16[%c0_90, %c0_91] : memref<1x64xf32, #tpu.memory_space<vmem>>, vector<1x64xf32>
    %217 = vector.broadcast %216 : vector<1x64xf32> to vector<8x64xf32>
    %218 = arith.addf %215, %217 : vector<8x64xf32>
    %cst_92 = arith.constant 5.000000e-01 : f32
    %219 = vector.broadcast %cst_92 : f32 to vector<8x64xf32>
    %220 = arith.mulf %219, %218 : vector<8x64xf32>
    %cst_93 = arith.constant 4.471500e-02 : f32
    %221 = vector.broadcast %cst_93 : f32 to vector<8x64xf32>
    %222 = arith.mulf %221, %218 : vector<8x64xf32>
    %223 = arith.mulf %222, %218 : vector<8x64xf32>
    %224 = arith.mulf %223, %218 : vector<8x64xf32>
    %225 = arith.addf %218, %224 : vector<8x64xf32>
    %cst_94 = arith.constant 0.797884583 : f32
    %226 = vector.broadcast %cst_94 : f32 to vector<8x64xf32>
    %227 = arith.mulf %226, %225 : vector<8x64xf32>
    %228 = math.tanh %227 : vector<8x64xf32>
    %cst_95 = arith.constant 1.000000e+00 : f32
    %229 = vector.broadcast %cst_95 : f32 to vector<8x64xf32>
    %230 = arith.addf %229, %228 : vector<8x64xf32>
    %231 = arith.mulf %220, %230 : vector<8x64xf32>
    %232 = arith.truncf %231 : vector<8x64xf32> to vector<8x64xbf16>
    %c0_96 = arith.constant 0 : index
    %c0_97 = arith.constant 0 : index
    %233 = vector.load %arg17[%c0_96, %c0_97] : memref<64x32xbf16, #tpu.memory_space<vmem>>, vector<64x32xbf16>
    %cst_98 = arith.constant dense<0.000000e+00> : vector<8x32xf32>
    %234 = tpu.matmul %232, %233, %cst_98 {dimension_numbers = #tpu.dot_dimension_numbers<[1], [0], [0], [1], [0, 0, 1, 1], [], []>} : vector<8x64xbf16>, vector<64x32xbf16>, vector<8x32xf32> -> vector<8x32xf32>
    %c0_99 = arith.constant 0 : index
    %c0_100 = arith.constant 0 : index
    %235 = vector.load %arg18[%c0_99, %c0_100] : memref<1x32xf32, #tpu.memory_space<vmem>>, vector<1x32xf32>
    %236 = vector.broadcast %235 : vector<1x32xf32> to vector<8x32xf32>
    %237 = arith.addf %234, %236 : vector<8x32xf32>
    %238 = arith.addf %212, %237 : vector<8x32xf32>
    %c0_101 = arith.constant 0 : index
    %c0_102 = arith.constant 0 : index
    %239 = vector.load %arg19[%c0_101, %c0_102] : memref<1x32xf32, #tpu.memory_space<vmem>>, vector<1x32xf32>
    %c0_103 = arith.constant 0 : index
    %c0_104 = arith.constant 0 : index
    %240 = vector.load %arg20[%c0_103, %c0_104] : memref<1x32xf32, #tpu.memory_space<vmem>>, vector<1x32xf32>
    %cst_105 = arith.constant dense<0.000000e+00> : vector<8xf32>
    %241 = vector.multi_reduction <add>, %238, %cst_105 [1] : vector<8x32xf32> to vector<8xf32>
    %242 = vector.shape_cast %241 : vector<8xf32> to vector<8x1xf32>
    %cst_106 = arith.constant 3.200000e+01 : f32
    %243 = vector.broadcast %cst_106 : f32 to vector<8x1xf32>
    %244 = arith.divf %242, %243 : vector<8x1xf32>
    %245 = vector.broadcast %244 : vector<8x1xf32> to vector<8x32xf32>
    %246 = arith.subf %238, %245 : vector<8x32xf32>
    %247 = arith.mulf %246, %246 : vector<8x32xf32>
    %cst_107 = arith.constant dense<0.000000e+00> : vector<8xf32>
    %248 = vector.multi_reduction <add>, %247, %cst_107 [1] : vector<8x32xf32> to vector<8xf32>
    %249 = vector.shape_cast %248 : vector<8xf32> to vector<8x1xf32>
    %cst_108 = arith.constant 3.200000e+01 : f32
    %250 = vector.broadcast %cst_108 : f32 to vector<8x1xf32>
    %251 = arith.divf %249, %250 : vector<8x1xf32>
    %252 = vector.broadcast %244 : vector<8x1xf32> to vector<8x32xf32>
    %253 = arith.subf %238, %252 : vector<8x32xf32>
    %cst_109 = arith.constant 9.99999996E-13 : f32
    %254 = vector.broadcast %cst_109 : f32 to vector<8x1xf32>
    %255 = arith.addf %251, %254 : vector<8x1xf32>
    %256 = math.rsqrt %255 : vector<8x1xf32>
    %257 = vector.broadcast %256 : vector<8x1xf32> to vector<8x32xf32>
    %258 = arith.mulf %253, %257 : vector<8x32xf32>
    %259 = vector.broadcast %239 : vector<1x32xf32> to vector<8x32xf32>
    %260 = arith.mulf %258, %259 : vector<8x32xf32>
    %261 = vector.broadcast %240 : vector<1x32xf32> to vector<8x32xf32>
    %262 = arith.addf %260, %261 : vector<8x32xf32>
    %c0_110 = arith.constant 0 : index
    %c0_111 = arith.constant 0 : index
    %c0_112 = arith.constant 0 : index
    %263 = vector.load %arg21[%c0_110, %c0_111, %c0_112] : memref<1x8x32xf32, #tpu.memory_space<vmem>>, vector<1x8x32xf32>
    %264 = vector.shape_cast %263 : vector<1x8x32xf32> to vector<8x32xf32>
    %265 = vector.shape_cast %262 : vector<8x32xf32> to vector<1x8x32xf32>
    tpu.vector_store %arg21[%c0_110, %c0_111, %c0_112], %265 {strides = array<i32>} : memref<1x8x32xf32, #tpu.memory_space<vmem>>, vector<1x8x32xf32>,
    return
  }
  func.func @transform_0(%arg0: i32, %arg1: i32) -> (i32, i32, i32) {
    %c0_i32 = arith.constant 0 : i32
    %c0_i32_0 = arith.constant 0 : i32
    %c0_i32_1 = arith.constant 0 : i32
    return %arg0, %c0_i32, %c0_i32_0 : i32, i32, i32
  }
  func.func @transform_1(%arg0: i32, %arg1: i32) -> (i32, i32, i32) {
    %c0_i32 = arith.constant 0 : i32
    %c0_i32_0 = arith.constant 0 : i32
    return %arg0, %arg1, %c0_i32 : i32, i32, i32
  }
  func.func @transform_2(%arg0: i32, %arg1: i32) -> (i32, i32, i32) {
    %c0_i32 = arith.constant 0 : i32
    %c0_i32_0 = arith.constant 0 : i32
    %c0_i32_1 = arith.constant 0 : i32
    return %arg0, %c0_i32, %c0_i32_0 : i32, i32, i32
  }
  func.func @transform_3(%arg0: i32, %arg1: i32) -> (i32, i32) {
    %c0_i32 = arith.constant 0 : i32
    %c0_i32_0 = arith.constant 0 : i32
    %c0_i32_1 = arith.constant 0 : i32
    return %c0_i32, %c0_i32_0 : i32, i32
  }
  func.func @transform_4(%arg0: i32, %arg1: i32) -> (i32, i32) {
    %c0_i32 = arith.constant 0 : i32
    %c0_i32_0 = arith.constant 0 : i32
    %c0_i32_1 = arith.constant 0 : i32
    return %c0_i32, %c0_i32_0 : i32, i32
  }
  func.func @transform_5(%arg0: i32, %arg1: i32) -> (i32, i32) {
    %c0_i32 = arith.constant 0 : i32
    %c0_i32_0 = arith.constant 0 : i32
    %c0_i32_1 = arith.constant 0 : i32
    return %c0_i32, %c0_i32_0 : i32, i32
  }
  func.func @transform_6(%arg0: i32, %arg1: i32) -> (i32, i32) {
    %c0_i32 = arith.constant 0 : i32
    %c0_i32_0 = arith.constant 0 : i32
    %c0_i32_1 = arith.constant 0 : i32
    return %c0_i32, %c0_i32_0 : i32, i32
  }
  func.func @transform_7(%arg0: i32, %arg1: i32) -> (i32, i32) {
    %c0_i32 = arith.constant 0 : i32
    %c0_i32_0 = arith.constant 0 : i32
    %c0_i32_1 = arith.constant 0 : i32
    return %c0_i32, %c0_i32_0 : i32, i32
  }
  func.func @transform_8(%arg0: i32, %arg1: i32) -> (i32, i32) {
    %c0_i32 = arith.constant 0 : i32
    %c0_i32_0 = arith.constant 0 : i32
    %c0_i32_1 = arith.constant 0 : i32
    return %c0_i32, %c0_i32_0 : i32, i32
  }
  func.func @transform_9(%arg0: i32, %arg1: i32) -> (i32, i32) {
    %c0_i32 = arith.constant 0 : i32
    %c0_i32_0 = arith.constant 0 : i32
    %c0_i32_1 = arith.constant 0 : i32
    return %c0_i32, %c0_i32_0 : i32, i32
  }
  func.func @transform_10(%arg0: i32, %arg1: i32) -> (i32, i32) {
    %c0_i32 = arith.constant 0 : i32
    %c0_i32_0 = arith.constant 0 : i32
    %c0_i32_1 = arith.constant 0 : i32
    return %c0_i32, %c0_i32_0 : i32, i32
  }
  func.func @transform_11(%arg0: i32, %arg1: i32) -> (i32, i32) {
    %c0_i32 = arith.constant 0 : i32
    %c0_i32_0 = arith.constant 0 : i32
    %c0_i32_1 = arith.constant 0 : i32
    return %c0_i32, %c0_i32_0 : i32, i32
  }
  func.func @transform_12(%arg0: i32, %arg1: i32) -> (i32, i32) {
    %c0_i32 = arith.constant 0 : i32
    %c0_i32_0 = arith.constant 0 : i32
    %c0_i32_1 = arith.constant 0 : i32
    return %c0_i32, %c0_i32_0 : i32, i32
  }
  func.func @transform_13(%arg0: i32, %arg1: i32) -> (i32, i32) {
    %c0_i32 = arith.constant 0 : i32
    %c0_i32_0 = arith.constant 0 : i32
    %c0_i32_1 = arith.constant 0 : i32
    return %c0_i32, %c0_i32_0 : i32, i32
  }
  func.func @transform_14(%arg0: i32, %arg1: i32) -> (i32, i32) {
    %c0_i32 = arith.constant 0 : i32
    %c0_i32_0 = arith.constant 0 : i32
    %c0_i32_1 = arith.constant 0 : i32
    return %c0_i32, %c0_i32_0 : i32, i32
  }
  func.func @transform_15(%arg0: i32, %arg1: i32) -> (i32, i32) {
    %c0_i32 = arith.constant 0 : i32
    %c0_i32_0 = arith.constant 0 : i32
    %c0_i32_1 = arith.constant 0 : i32
    return %c0_i32, %c0_i32_0 : i32, i32
  }
  func.func @transform_16(%arg0: i32, %arg1: i32) -> (i32, i32) {
    %c0_i32 = arith.constant 0 : i32
    %c0_i32_0 = arith.constant 0 : i32
    %c0_i32_1 = arith.constant 0 : i32
    return %c0_i32, %c0_i32_0 : i32, i32
  }
  func.func @transform_17(%arg0: i32, %arg1: i32) -> (i32, i32) {
    %c0_i32 = arith.constant 0 : i32
    %c0_i32_0 = arith.constant 0 : i32
    %c0_i32_1 = arith.constant 0 : i32
    return %c0_i32, %c0_i32_0 : i32, i32
  }
  func.func @transform_18(%arg0: i32, %arg1: i32) -> (i32, i32) {
    %c0_i32 = arith.constant 0 : i32
    %c0_i32_0 = arith.constant 0 : i32
    %c0_i32_1 = arith.constant 0 : i32
    return %c0_i32, %c0_i32_0 : i32, i32
  }
  func.func @transform_19(%arg0: i32, %arg1: i32) -> (i32, i32, i32) {
    %c0_i32 = arith.constant 0 : i32
    %c0_i32_0 = arith.constant 0 : i32
    return %arg0, %arg1, %c0_i32 : i32, i32, i32
  }
  func.func @transform_20(%arg0: i32, %arg1: i32) -> (i32, i32, i32, i32) {
    %c0_i32 = arith.constant 0 : i32
    %c0_i32_0 = arith.constant 0 : i32
    %c0_i32_1 = arith.constant 0 : i32
    return %arg0, %c0_i32, %arg1, %c0_i32_0 : i32, i32, i32, i32
  }
}

</mosaic_0001>

<bundles_post_ra>
// kernel: _lambda_.1
= control target key start
LH: loop header
LB: loop body
LE: loop exit
PB: predicated region body
PF: predicated region fallthrough
CT: control target
= control target key end

     0   :  { %s2180_s0 = inlined_call_operand.vmem [shape: bf16[2,8,32], index: 0, kind: input, shape index: {}, may-alias: {0,1}]   ;;  %s2181_s1 = inlined_call_operand.vmem [shape: bf16[2,8,32], index: 1, kind: input, shape index: {}, may-alias: {0,1}]   ;;  %s2182_s2 = inlined_call_operand.vmem [shape: f32[2,1,8], index: 2, kind: input, shape index: {}]   ;;  %s2183_s3 = inlined_call_operand.vmem [shape: f32[1,32], index: 3, kind: input, shape index: {}]   ;;  %s2184_s4 = inlined_call_operand.vmem [shape: f32[1,32], index: 4, kind: input, shape index: {}]   ;;  %s2185_s5 = inlined_call_operand.vmem [shape: bf16[32,32], index: 5, kind: input, shape index: {}]   ;;  %s2186_s6 = inlined_call_operand.vmem [shape: f32[1,32], index: 6, kind: input, shape index: {}]   ;;  %s2187_s7 = inlined_call_operand.vmem [shape: bf16[32,64], index: 7, kind: input, shape index: {}]   ;;  %s2188_s8 = inlined_call_operand.vmem [shape: f32[1,64], index: 8, kind: input, shape index: {}]   ;;  %s2189_s9 = inlined_call_operand.vmem [shape: bf16[32,32], index: 9, kind: input, shape index: {}]   ;;  %s2190_s10 = inlined_call_operand.vmem [shape: f32[1,32], index: 10, kind: input, shape index: {}]   ;;  %s2191_s11 = inlined_call_operand.vmem [shape: f32[1,32], index: 11, kind: input, shape index: {}]   ;;  %s2192_s12 = inlined_call_operand.vmem [shape: f32[1,32], index: 12, kind: input, shape index: {}]   ;;  %s2193_s13 = inlined_call_operand.vmem [shape: bf16[32,64], index: 13, kind: input, shape index: {}]   ;;  %s2194_s14 = inlined_call_operand.vmem [shape: f32[1,64], index: 14, kind: input, shape index: {}]   ;;  %s2195_s15 = inlined_call_operand.vmem [shape: bf16[64,32], index: 15, kind: input, shape index: {}]   ;;  %s2196_s16 = inlined_call_operand.vmem [shape: f32[1,32], index: 16, kind: input, shape index: {}]   ;;  %s2197_s17 = inlined_call_operand.vmem [shape: f32[1,32], index: 17, kind: input, shape index: {}]   ;;  %s2198_s18 = inlined_call_operand.vmem [shape: f32[1,32], index: 18, kind: input, shape index: {}]   ;;  %s2199_s19 = inlined_call_operand.hbm [shape: f32[2,8,32], index: 19, kind: output, shape index: {0}]   ;;  %s2200_s20 = inlined_call_operand.hbm [shape: bf16[2,4,8,8], index: 20, kind: output, shape index: {1}]  }
   0x1   :  { %2206 = sst [smem:[#allocation13_spill]] %s2180_s0 }
   0x2   :  { %2207 = sst [smem:[#allocation14_spill]] %s2181_s1 }
   0x3   :  { %2208 = sst [smem:[#allocation15_spill]] %s2182_s2 }
   0x4   :  { %2209 = sst [smem:[#allocation16_spill]] %s2183_s3 }
   0x5   :  { %2210 = sst [smem:[#allocation17_spill]] %s2184_s4 }
   0x6   :  { %2211 = sst [smem:[#allocation18_spill]] %s2185_s5 }
   0x7   :  { %2212 = sst [smem:[#allocation19_spill]] %s2186_s6 }
   0x8   :  { %2213 = sst [smem:[#allocation20_spill]] %s2187_s7 }
   0x9   :  { %2214 = sst [smem:[#allocation21_spill]] %s2188_s8 }
   0xa   :  { %2215 = sst [smem:[#allocation22_spill]] %s2189_s9 }
   0xb   :  { %2216 = sst [smem:[#allocation23_spill]] %s2198_s18 }
   0xc   :  { %2217 = sst [smem:[#allocation24_spill]] %s2199_s19 }
   0xd   :  { %26 = vsyncpa [#allocation4], 0 }
   0xe   :  { %28 = vsyncpa [#allocation4 + $0x1], 0 }
   0xf   :  { %29 = vsyncpa [#allocation6], 0 }
  0x10   :  { %31 = vsyncpa [#allocation6 + $0x1], 0  ;;  %s1906_s1 = smov 0   ;;  %s1908_s22 = smov 0  }
  0x11   :  { %s1910_s23 = smov 0   ;;  %s1912_s24 = smov 0  }
  0x12   :  { %s1914_s2 = smov 0   ;;  %s1916_s25 = smov 0  }
  0x13 LB: > { %2218 = sst [smem:[#allocation9_spill]] %s1766_s1  ;;  %s1471_s3 = sadd.s32 4294967295, %s1786_s25   ;;  %s1786_s25 = sphi %s1916_s25, %s37_s25   ;;  %s1782_s2 = sphi %s1914_s2, %s2239_s2   ;;  %s1778_s24 = sphi %s1912_s24, %s2238_s24   ;;  %s1774_s23 = sphi %s1910_s23, %s2242_s23   ;;  %s1770_s22 = sphi %s1908_s22, %s2241_s22   ;;  %s1766_s1 = sphi %s1906_s1, %s2240_s1  }
  0x14   : > { %2219 = sst [smem:[#allocation10_spill]] %s1782_s2  ;;  %s1472_s26 = sadd.s32 4294967294, %s1786_s25  }
  0x15   : > { %s49_s27 = sadd.s32 1, %s1782_s2  ;;  %s474_s28 = sadd.s32 1, %s1774_s23 }
  0x16   : > { %p51_p0 = scmp.ge.s32.totalorder %s49_s27, 2  ;;  %p484_p1 = scmp.ne.s32.totalorder %s1774_s23, %s1770_s22 }
  0x17   : > { %p485_p2 = scmp.eq.s32.totalorder %s1471_s3, 1  ;;  %p490_p3 = scmp.ne.s32.totalorder %s1770_s22, %s1766_s1 }
  0x18   : > { %s2244_s27 = smov (%p51_p0, %s49_s27), 0  ;;  %p491_p5 = scmp.eq.s32.totalorder %s1472_s26, 1 }
  0x19   : > { %2220 = sst [smem:[#allocation11_spill]] %s2244_s27  ;;  %p1946_p4 = por %p485_p2, %p484_p1 }
  0x1a   : > { %s469_s29 = ssub.s32 %s1782_s2, %s2244_s27  ;;  %p1475_p6 = scmp.ge.s32.totalorder %s1786_s25, 1 }
  0x1b   : > { %p472_p7 = scmp.eq.s32.totalorder %s469_s29, 0  ;;  %p1953_p8 = por %p491_p5, %p490_p3 }
  0x1c   : > { %p608_p9 = scmp.lt.s32.totalorder %s1786_s25, 3 }
  0x1d   : > { %s2222_s30 = scalar_select %p1953_p8, 1, 0 }
  0x1e   : > { %s1959_s0 = scalar_select %p472_p7, %s1774_s23, %s474_s28  }
  0x1f   : > { %2223 = sst [smem:[#allocation12_spill]] %s2222_s30  ;;  %p609_p10 = pnand %p1475_p6, %p608_p9 }
  0x20   : > { %p680_p11 = scmp.lt.s32.totalorder (!%p609_p10), %s1778_s24, 1  ;;  %s2224_s2 = sld [smem:[#allocation13_spill]] (!%p609_p10) }
  0x21   : > { %612 = sbr.rel (%p609_p10) target bundleno = 2482 (0x9b2), region = 96  ;;  %s2225_s19 = sld [smem:[#allocation14_spill]] (!%p609_p10) }
  0x22   : > { %s2226_s7 = sld [smem:[#allocation20_spill]] (!%p609_p10)  ;;  %s1797_s1 = smov (!%p609_p10), 8  }
  0x23   : > { %s2227_s5 = sld [smem:[#allocation18_spill]] (!%p609_p10) }
  0x24   : > { %s2228_s18 = sld [smem:[#allocation16_spill]] (!%p609_p10) }
  0x25   : > { %s2230_s8 = sld [smem:[#allocation21_spill]] (!%p609_p10) }
  0x26   : > { %s1963_s21 = scalar_select %p680_p11, %s1778_s24, 1  ;;  %vm704_vm0 = vcmask 261120   ;;  %v1788_v6 = vmov 32.0   ;;  %vm845_vm8 = vcmask 64512   ;;  %vm885_vm9 = vcmask 1043456  }
  0x27   : > { %1648 = vrcp.f32 %v1788_v6  ;;  %s2231_s6 = sld [smem:[#allocation19_spill]]  ;;  %vm877_vm10 = vcmask 60416   ;;  %vm968_vm11 = vcmask 126016   ;;  %vm1033_vm12 = vcmask 191616  }
  0x28   : > { %s1478_s3 = sshll.u32 %s1963_s21, 2  ;;  %v1552_v23 = vld [vmem:[%s2226_s7 + $0x8] sm:$0xff]  ;;  %v1551_v24 = vld [vmem:[%s2226_s7] sm:$0xff]  ;;  %s2232_s27 = sld [smem:[#allocation15_spill]]  ;;  %vm1098_vm13 = vcmask 257216  }
  0x29   : > { %s683_s29 = scalar_lea.vmem %s2224_s2, %s1478_s3  ;;  %s690_s30 = scalar_lea.vmem %s2225_s19, %s1478_s3  ;;  %796 = vmatpush.bf16.msra.mxu0 %v1552_v23  ;;  %v1554_v25 = vld [vmem:[%s2227_s5 + $0x8] sm:$0xff]  ;;  %v1553_v27 = vld [vmem:[%s2227_s5] sm:$0xff] }
  0x2a   : > { %v695_v0 = vld [vmem:[%s683_s29] sm:$0xf]  ;;  %833 = vmatpush.bf16.msra.mxu1 %v1554_v25  ;;  %s2229_s2 = sld [smem:[#allocation17_spill]]  ;;  %s1790_s3 = smov 120  }
  0x2b   : > { %v696_v1 = vunpack.c.l.bf16 %v695_v0  ;;  %v697_v2 = vld [vmem:[%s690_s30] sm:$0xf]  ;;  %s1789_s30 = smov 96   ;;  %s1792_s19 = smov 104  }
  0x2c   : > { %v698_v4 = vunpack.c.l.bf16 %v697_v2  ;;  %v1637_v41 = vld [vmem:[%s2228_s18] ss:$0 sm:$0xff]  ;;  %s1791_s18 = smov 112   ;;  %s1794_s29 = smov 80  }
  0x2d   : > { %v705_v3 = vsel %vm704_vm0, %v696_v1, 0.0  ;;  %v1649_v7 = vpop.eup %1648  ;;  %797 = vmatpush.bf16.msra.mxu0 %v1551_v24  ;;  %v1639_v57 = vld [vmem:[%s2230_s8] ss:$0 sm:$0xff]  ;;  %s2233_s9 = sld [smem:[#allocation22_spill]]  ;;  %s1696_s7 = scalar_lea.hbm %s2200_s20, 32 }
  0x2e   : > { %706 = vadd.xlane.f32.xlu0 %v705_v3  ;;  %v742_v5 = vsel %vm704_vm0, %v698_v4, 0.0  ;;  %v709_v8 = vmul.f32 32.0, %v1649_v7  ;;  %vm713_vm1 = vweird.f32 %v1649_v7  ;;  %834 = vmatpush.bf16.msra.mxu1 %v1553_v27  ;;  %v1640_v62 = vld [vmem:[%s2231_s6] ss:$0 sm:$0xff]  ;;  %s693_s28 = scalar_lea.vmem %s2232_s27, %s1963_s21  ;;  %s1793_s21 = smov 88  }
  0x30   : > { %v710_v9 = vsub.f32 1.0, %v709_v8  ;;  %v1638_v45 = vld [vmem:[%s2229_s2] ss:$0 sm:$0xff]  ;;  %s1798_s2 = smov 24  }
  0x32   : > { %v711_v10 = vmul.f32 %v1649_v7, %v710_v9 }
  0x34   : > { %v712_v11 = vadd.f32 %v1649_v7, %v711_v10  ;;  %v699_v10 = vld [vmem:[%s693_s28] sm:$0x1] }
  0x36   : > { %743 = vadd.xlane.f32.xlu0 %v742_v5  ;;  %v1974_v12 = vsel %vm713_vm1, %v1649_v7, %v712_v11  ;;  %v700_v11 = vsub.f32 1.0, %v699_v10 }
  0xa1   : > { %v707_v13 = vpop.xlane.xlu0 %706 }
  0xa2   : > { %v715_v14 = vmul.f32 %v1974_v12, %v707_v13 }
  0xa4   : > { %v716_v15 = vsub.f32 %v696_v1, %v715_v14  ;;  %v701_v14 = vmul.f32 -1e+09, %v700_v11 }
  0xa6   : > { %v717_v16 = vmul.f32 %v716_v15, %v716_v15 }
  0xa8   : > { %v718_v17 = vsel %vm704_vm0, %v717_v16, 0.0 }
  0xa9   : > { %719 = vadd.xlane.f32.xlu1 %v718_v17  ;;  %v744_v18 = vpop.xlane.xlu0 %743 }
  0xaa   : > { %v745_v19 = vmul.f32 %v744_v18, %v1974_v12 }
  0xac   : > { %v746_v20 = vsub.f32 %v698_v4, %v745_v19 }
  0xae   : > { %v747_v21 = vmul.f32 %v746_v20, %v746_v20 }
  0xb0   : > { %v748_v22 = vsel %vm704_vm0, %v747_v21, 0.0 }
  0xb1   : > { %749 = vadd.xlane.f32.xlu1 %v748_v22 }
 0x11c   : > { %v720_v26 = vpop.xlane.xlu1 %719 }
 0x11d   : > { %v721_v28 = vmul.f32 %v720_v26, %v1974_v12 }
 0x11f   : > { %v722_v29 = vadd.f32 1e-12, %v721_v28 }
 0x121   : > { %1650 = vrsqrt.f32 %v722_v29  ;;  %vm729_vm3 = vweird.f32 %v722_v29 }
 0x124   : > { %v750_v30 = vpop.xlane.xlu1 %749 }
 0x125   : > { %v751_v31 = vmul.f32 %v750_v30, %v1974_v12 }
 0x127   : > { %v1651_v32 = vpop.eup %1650  ;;  %v752_v33 = vadd.f32 1e-12, %v751_v31 }
 0x128   : > { %v724_v34 = vmul.f32 %v1651_v32, %v722_v29  ;;  %vm730_vm2 = vweird.f32 %v1651_v32 }
 0x129   : > { %1652 = vrsqrt.f32 %v752_v33  ;;  %vm731_vm4 = vmor %vm729_vm3, %vm730_vm2  ;;  %vm759_vm6 = vweird.f32 %v752_v33  ;;  %vm1253_vm2 = vcmask 523264  }
 0x12a   : > { %v725_v35 = vmul.f32 %v1651_v32, %v724_v34 }
 0x12c   : > { %v726_v36 = vmul.f32 0.5, %v725_v35 }
 0x12e   : > { %v727_v37 = vsub.f32 1.5, %v726_v36 }
 0x12f   : > { %v1653_v38 = vpop.eup %1652 }
 0x130   : > { %v728_v39 = vmul.f32 %v1651_v32, %v727_v37  ;;  %v754_v40 = vmul.f32 %v1653_v38, %v752_v33  ;;  %vm760_vm5 = vweird.f32 %v1653_v38 }
 0x131   : > { %vm761_vm7 = vmor %vm759_vm6, %vm760_vm5 }
 0x132   : > { %v732_v42 = vsel %vm731_vm4, %v1651_v32, %v728_v39  ;;  %v755_v43 = vmul.f32 %v1653_v38, %v754_v40 }
 0x133   : > { %v733_v44 = vmul.f32 %v732_v42, %v716_v15  ;;  %v843_v15 = vperm.slane %v701_v14, 0 }
 0x134   : > { %v756_v46 = vmul.f32 0.5, %v755_v43 }
 0x135   : > { %v737_v47 = vmul.f32 %v1637_v41, %v733_v44 }
 0x136   : > { %v757_v48 = vsub.f32 1.5, %v756_v46 }
 0x137   : > { %v741_v49 = vadd.f32 %v1638_v45, %v737_v47 }
 0x138   : > { %v758_v50 = vmul.f32 %v1653_v38, %v757_v48 }
 0x139   : > { %v766_v51 = vpack.c.bf16 %v741_v49, %v741_v49 }
 0x13a   : > { %v762_v52 = vsel %vm761_vm7, %v1653_v38, %v758_v50 }
 0x13b   : > { %v763_v53 = vmul.f32 %v762_v52, %v746_v20  ;;  %1488 = vmatmul.msk.bf16.vlgmr.msra.gmra.mxu0 %vm704_vm0, %v766_v51 }
 0x13d   : > { %v764_v54 = vmul.f32 %v1637_v41, %v763_v53 }
 0x13f   : > { %v2001_v55 = vadd.f32 %v1638_v45, %v764_v54 }
 0x141   : > { %v803_v56 = vpack.c.bf16 %v2001_v55, %v2001_v55 }
 0x143   : > { %1497 = vmatmul.msk.bf16.vlgmr.msra.gmra.mxu1 %vm704_vm0, %v803_v56 }
 0x1b8   : > { %v799_v58 = vpop.f32.mrf.mxu0 }
 0x1b9   : > { %v800_v59 = vadd.f32 %v1639_v57, %v799_v58 }
 0x1bb   : > { %v2009_v60 = vpack.c.bf16 %v800_v59, %v800_v59 }
 0x1bd   : > { %880 = vrot.lane.b32.xlu0 %v2009_v60, %s1789_s30  ;;  %907 = vrot.lane.b32.xlu1 %v2009_v60, %s1790_s3  ;;  %v850_v61 = vsel %vm845_vm8, %v2009_v60, 0  ;;  %s2038_s30 = sand.u32 1, %s1770_s22  }
 0x1be   : > { %859 = vmatpush.bf16.xpose.msra.mxu2 %v850_v61 }
 0x1c0   : > { %v801_v63 = vpop.f32.mrf.mxu0  ;;  %v836_v0 = vpop.f32.mrf.mxu1 }
 0x1c1   : > { %v837_v1 = vadd.f32 %v1640_v62, %v836_v0 }
 0x1c3   : > { %v840_v2 = vpack.c.bf16 %v837_v1, %v837_v1 }
 0x1c5   : > { %972 = vrot.lane.b32.xlu0 %v2009_v60, %s1791_s18  ;;  %970 = vrot.lane.b32.xlu1 %v840_v2, %s1791_s18  ;;  %s1795_s18 = smov 72  }
 0x1c6   : > { %1498 = vmatmul.msk.bf16.vlgmr.msra.gmra.mxu2 %vm845_vm8, %v840_v2 }
 0x1c8   : > { %v838_v3 = vpop.f32.mrf.mxu1 }
 0x1cd   : > { %1035 = vrot.lane.b32.xlu0 %v840_v2, %s1792_s19 }
 0x22f   : > { %v908_v4 = vpop.permute.xlu1 %907  ;;  %v881_v5 = vpop.permute.xlu0 %880 }
 0x230   : > { %v887_v6 = vsel %vm885_vm9, %v881_v5, 0  ;;  %v913_v7 = vsel %vm845_vm8, %v908_v4, 0 }
 0x231   : > { %896 = vmatpush.bf16.msra.mxu3 %v887_v6 }
 0x235   : > { %922 = vmatpush.bf16.xpose.msrb.mxu3 %v913_v7 }
 0x237   : > { %v973_v8 = vpop.permute.xlu0 %972  ;;  %v971_v13 = vpop.permute.xlu1 %970 }
 0x238   : > { %v978_v9 = vsel %vm845_vm8, %v973_v8, 0 }
 0x239   : > { %987 = vmatpush.bf16.xpose.msrb.mxu1 %v978_v9 }
 0x23f   : > { %v1036_v39 = vpop.permute.xlu0 %1035 }
 0x240   : > { %1503 = vmatmul.msk.bf16.vlgmr.msrb.gmra.mxu1 %vm845_vm8, %v971_v13 }
 0x249   : > { %v861_v16 = vpop.f32.mrf.mxu2 }
 0x24a   : > { %v862_v17 = vadd.f32 %v861_v16, %v843_v15 }
 0x24c   : > { %v865_v18 = vsel %vm845_vm8, %v862_v17, -inf }
 0x24d   : > { %866 = vmax.xlane.f32.xlu2 %v865_v18 }
 0x251   : > { %v863_v19 = vpop.f32.mrf.mxu2 }
 0x265   : > { %905 = vrot.lane.b32.xlu2 %v840_v2, %s1790_s3  ;;  %s1477_s3 = sshll.u32 %s2038_s30, 4 }
 0x266   : > { %s2043_s26 = scalar_lea.vmem [#allocation5], %s1477_s3  ;;  %s1310_s3 = scalar_lea.sflag [#allocation6], %s2038_s30 }
 0x267   : > { %s1338_s28 = sshll.u32 %s2043_s26, 4  ;;  %s1339_s28 = int_to_ptr.vmem [resolvable:$true] %s1338_s28 }
 0x2bd   : > { %v989_v20 = vpop.f32.mrf.mxu1 }
 0x2be   : > { %v990_v21 = vadd.f32 %v989_v20, %v843_v15 }
 0x2c0   : > { %v867_v22 = vpop.xlane.xlu2 %866  ;;  %v993_v23 = vsel %vm845_vm8, %v990_v21, -inf }
 0x2c1   : > { %v868_v24 = vsub.f32 %v862_v17, %v867_v22  ;;  %994 = vmax.xlane.f32.xlu1 %v993_v23 }
 0x2c3   : > { %v869_v25 = vmul.f32 1.442695, %v868_v24 }
 0x2c5   : > { %1654 = vpow2.f32 %v869_v25  ;;  %v991_v26 = vpop.f32.mrf.mxu1 }
 0x2c8   : > { %v906_v29 = vpop.permute.xlu2 %905 }
 0x2cb   : > { %v1655_v27 = vpop.eup %1654 }
 0x2cc   : > { %v871_v28 = vsel %vm845_vm8, %v1655_v27, 0.0 }
 0x2cd   : > { %872 = vadd.xlane.f32.xlu2 %v871_v28  ;;  %v1556_v28 = vld [vmem:[%s2233_s9 + $0x8] sm:$0xff] }
 0x2ce   : > { %1130 = vmatpush.bf16.msra.mxu1 %v1556_v28 }
 0x2da   : > { %942 = vrot.lane.b32.xlu1 %v2009_v60, %s1793_s21 }
 0x2e5   : > { %1037 = vrot.lane.b32.xlu2 %v2009_v60, %s1792_s19  ;;  %s1796_s19 = smov 16  }
 0x334   : > { %v995_v31 = vpop.xlane.xlu1 %994 }
 0x335   : > { %v996_v47 = vsub.f32 %v990_v21, %v995_v31 }
 0x337   : > { %v997_v48 = vmul.f32 1.442695, %v996_v47 }
 0x340   : > { %v873_v30 = vpop.xlane.xlu2 %872 }
 0x341   : > { %1656 = vrcp.f32 %v873_v30 }
 0x342   : > { %1658 = vpow2.f32 %v997_v48 }
 0x347   : > { %v1657_v32 = vpop.eup %1656 }
 0x348   : > { %v875_v33 = vmul.f32 %v1657_v32, %v1655_v27  ;;  %v1038_v34 = vpop.permute.xlu2 %1037  ;;  %v1659_v52 = vpop.eup %1658 }
 0x349   : > { %v1043_v36 = vsel %vm845_vm8, %v1038_v34, 0  ;;  %v999_v54 = vsel %vm845_vm8, %v1659_v52, 0.0  ;;  %v1641_v34 = vld [vmem:[%s2190_s10] ss:$0 sm:$0xff] }
 0x34a   : > { %v876_v35 = vpack.c.bf16 %v875_v33, %v875_v33 }
 0x34c   : > { %1499 = vmatmul.msk.bf16.vlgmr.msra.gmra.mxu3 %vm845_vm8, %v876_v35  ;;  %v943_v37 = vpop.permute.xlu1 %942  ;;  %878 = vst.msk [vmem:[%s2043_s26] sm:$0xf] %vm877_vm10, %v876_v35 }
 0x34d   : > { %1052 = vmatpush.bf16.xpose.msra.mxu3 %v1043_v36  ;;  %v948_v38 = vsel %vm885_vm9, %v943_v37, 0 }
 0x34e   : > { %957 = vmatpush.bf16.msrb.mxu0 %v948_v38 }
 0x35c   : > { %1500 = vmatmul.msk.bf16.vlgmr.msrb.gmra.mxu3 %vm845_vm8, %v906_v29  ;;  %v1555_v29 = vld [vmem:[%s2233_s9] sm:$0xff] }
 0x35d   : > { %1131 = vmatpush.bf16.msra.mxu1 %v1555_v29 }
 0x36c   : > { %1506 = vmatmul.msk.bf16.vlgmr.msra.gmra.mxu3 %vm845_vm8, %v1036_v39 }
 0x3cf   : > { %v898_v40 = vpop.f32.mrf.mxu3 }
 0x3d0   : > { %v902_v41 = vpack.c.bf16 %v898_v40, %v898_v40 }
 0x3d2   : > { %903 = vst.msk [vmem:[#allocation2] sm:$0xf] %vm877_vm10, %v902_v41 }
 0x3d7   : > { %v900_v42 = vpop.f32.mrf.mxu3 }
 0x3df   : > { %v924_v43 = vpop.f32.mrf.mxu3 }
 0x3e0   : > { %v925_v44 = vadd.f32 %v924_v43, %v843_v15 }
 0x3e2   : > { %v928_v45 = vsel %vm845_vm8, %v925_v44, -inf }
 0x3e3   : > { %929 = vmax.xlane.f32.xlu2 %v928_v45  ;;  %v1558_v45 = vld [vmem:[%s2193_s13 + $0x8] sm:$0xff] }
 0x3e7   : > { %v926_v46 = vpop.f32.mrf.mxu3 }
 0x3ef   : > { %v1054_v49 = vpop.f32.mrf.mxu3 }
 0x3f0   : > { %v1055_v50 = vadd.f32 %v1054_v49, %v843_v15 }
 0x3f2   : > { %v1058_v51 = vsel %vm845_vm8, %v1055_v50, -inf }
 0x3f3   : > { %1059 = vmax.xlane.f32.xlu0 %v1058_v51 }
 0x3f7   : > { %v1056_v53 = vpop.f32.mrf.mxu3 }
 0x3fb   : > { %1000 = vadd.xlane.f32.xlu0 %v999_v54 }
 0x40f   : > { %1007 = vrot.lane.b32.xlu0 %v2009_v60, %s1794_s29 }
 0x456   : > { %v930_v56 = vpop.xlane.xlu2 %929 }
 0x457   : > { %v931_v57 = vsub.f32 %v925_v44, %v930_v56  ;;  %v1642_v56 = vld [vmem:[%s2191_s11] ss:$0 sm:$0xff] }
 0x459   : > { %v932_v58 = vmul.f32 1.442695, %v931_v57 }
 0x45b   : > { %1660 = vpow2.f32 %v932_v58  ;;  %v1643_v58 = vld [vmem:[%s2192_s12] ss:$0 sm:$0xff] }
 0x461   : > { %v1661_v59 = vpop.eup %1660 }
 0x462   : > { %v934_v61 = vsel %vm845_vm8, %v1661_v59, 0.0 }
 0x463   : > { %935 = vadd.xlane.f32.xlu2 %v934_v61 }
 0x466   : > { %v1060_v62 = vpop.xlane.xlu0 %1059 }
 0x467   : > { %v1061_v63 = vsub.f32 %v1055_v50, %v1060_v62 }
 0x469   : > { %v1062_v0 = vmul.f32 1.442695, %v1061_v63 }
 0x46b   : > { %1662 = vpow2.f32 %v1062_v0  ;;  %v1562_v0 = vld [vmem:[%s2195_s15 + $0x18] sm:$0xff] }
 0x46c   : > { %1261 = vmatpush.bf16.msrb.mxu3 %v1562_v0 }
 0x46e   : > { %v1001_v1 = vpop.xlane.xlu0 %1000 }
 0x46f   : > { %1664 = vrcp.f32 %v1001_v1  ;;  %v1561_v1 = vld [vmem:[%s2195_s15 + $0x10] sm:$0xff] }
 0x470   : > { %1262 = vmatpush.bf16.msrb.mxu3 %v1561_v1 }
 0x471   : > { %v1663_v2 = vpop.eup %1662 }
 0x472   : > { %v1064_v3 = vsel %vm845_vm8, %v1663_v2, 0.0 }
 0x473   : > { %1065 = vadd.xlane.f32.xlu2 %v1064_v3  ;;  %v1559_v3 = vld [vmem:[%s2195_s15] sm:$0xff] }
 0x475   : > { %v1665_v4 = vpop.eup %1664 }
 0x476   : > { %v1003_v5 = vmul.f32 %v1665_v4, %v1659_v52  ;;  %v1644_v4 = vld [vmem:[%s2194_s14] ss:$0 sm:$0xff] }
 0x478   : > { %v1004_v6 = vpack.c.bf16 %v1003_v5, %v1003_v5 }
 0x47a   : > { %1504 = vst.msk [vmem:[%s2043_s26 + $0x8] sm:$0xf] %vm877_vm10, %v1004_v6 }
 0x481   : > { %v1008_v7 = vpop.permute.xlu0 %1007 }
 0x482   : > { %v1013_v8 = vsel %vm885_vm9, %v1008_v7, 0 }
 0x483   : > { %1022 = vmatpush.bf16.msrb.mxu2 %v1013_v8 }
 0x486   : > { %1505 = vmatmul.msk.bf16.vlgmr.msrb.gmra.mxu2 %vm845_vm8, %v1004_v6 }
 0x487   : > { %1200 = vmatpush.bf16.msra.mxu2 %v1558_v45 }
 0x48b   : > { %1072 = vrot.lane.b32.xlu2 %v2009_v60, %s1795_s18 }
 0x4d6   : > { %v936_v9 = vpop.xlane.xlu2 %935 }
 0x4d7   : > { %1666 = vrcp.f32 %v936_v9 }
 0x4dd   : > { %v1667_v10 = vpop.eup %1666 }
 0x4de   : > { %v938_v11 = vmul.f32 %v1667_v10, %v1661_v59 }
 0x4e0   : > { %v939_v13 = vpack.c.bf16 %v938_v11, %v938_v11 }
 0x4e2   : > { %1502 = vmatmul.msk.bf16.vlgmr.msrb.gmra.mxu0 %vm845_vm8, %v939_v13  ;;  %1501 = vst.msk [vmem:[%s2043_s26 + $0x4] sm:$0xf] %vm877_vm10, %v939_v13 }
 0x4e6   : > { %v1066_v14 = vpop.xlane.xlu2 %1065 }
 0x4e7   : > { %1668 = vrcp.f32 %v1066_v14 }
 0x4ed   : > { %v1669_v15 = vpop.eup %1668 }
 0x4ee   : > { %v1068_v16 = vmul.f32 %v1669_v15, %v1663_v2  ;;  %v1073_v17 = vpop.permute.xlu2 %1072  ;;  %v1560_v2 = vld [vmem:[%s2195_s15 + $0x8] sm:$0xff] }
 0x4ef   : > { %v1078_v18 = vsel %vm885_vm9, %v1073_v17, 0  ;;  %1263 = vmatpush.bf16.msrb.mxu3 %v1560_v2 }
 0x4f0   : > { %v1069_v19 = vpack.c.bf16 %v1068_v16, %v1068_v16  ;;  %1087 = vmatpush.bf16.msra.mxu0 %v1078_v18 }
 0x4f2   : > { %1507 = vst.msk [vmem:[%s2043_s26 + $0xc] sm:$0xf] %vm877_vm10, %v1069_v19 }
 0x4f3   : > { %1508 = vmatmul.msk.bf16.vlgmr.msra.gmra.mxu0 %vm845_vm8, %v1069_v19  ;;  %1264 = vmatpush.bf16.msrb.mxu3 %v1559_v3  ;;  %v1645_v19 = vld [vmem:[%s2196_s16] ss:$0 sm:$0xff] }
 0x509   : > { %v1024_v60 = vpop.f32.mrf.mxu2 }
 0x50a   : > { %v1028_v20 = vpack.c.bf16 %v1024_v60, %v1024_v60 }
 0x50c   : > { %1030 = vrot.lane.b32.xlu0 %v1028_v20, %s1796_s19  ;;  %s1563_s19 = sshll.u32 %s1778_s24, 4 }
 0x50d   : > { %s1337_s27 = scalar_lea.hbm %s2200_s20, %s1563_s19 }
 0x50e   : > { %s1340_s21 = sshll.u32 %s1337_s27, 4  ;;  %s1341_s21 = int_to_ptr.hbm [resolvable:$true] %s1340_s21 }
 0x50f   : > { %s1690_s29 = sshra.s32 %s1341_s21, 4  ;;  %s1691_s29 = int_to_ptr.hbm [resolvable:$true] %s1690_s29 }
 0x510   : > { %s1692_s18 = scalar_lea.hbm %s1691_s29, 16  ;;  %p1697_p1 = scmp.lt.s32.totalorder %s1691_s29, %s2200_s20 }
 0x511   : > { %v1026_v21 = vpop.f32.mrf.mxu2  ;;  %p1693_p12 = scmp.ne.s32.totalorder %s1691_s29, %s1692_s18  ;;  %p1698_p2 = scmp.lt.s32.totalorder %s1696_s7, %s1692_s18 }
 0x513   : > { %p1694_p13 = pnand %p1693_p12, %p1946_p4  ;;  %p1699_p3 = por %p1698_p2, %p1697_p1 }
 0x515   : > { %p1695_p0 = pneg %p1694_p13 }
 0x517   : > { %p1700_p5 = pnand %p1699_p3, %p1695_p0 }
 0x55f   : > { %v959_v22 = vpop.f32.mrf.mxu0 }
 0x560   : > { %v963_v23 = vpack.c.bf16 %v959_v22, %v959_v22 }
 0x562   : > { %965 = vrot.lane.b32.xlu1 %v963_v23, %s1797_s1 }
 0x567   : > { %v961_v24 = vpop.f32.mrf.mxu0 }
 0x570   : > { %v1089_v25 = vpop.f32.mrf.mxu0 }
 0x571   : > { %v1093_v26 = vpack.c.bf16 %v1089_v25, %v1089_v25 }
 0x573   : > { %1095 = vrot.lane.b32.xlu1 %v1093_v26, %s1798_s2 }
 0x578   : > { %v1091_v27 = vpop.f32.mrf.mxu0 }
 0x57e   : > { %v1031_v31 = vpop.permute.xlu0 %1030 }
 0x5d4   : > { %v966_v30 = vpop.permute.xlu1 %965 }
 0x5d5   : > { %969 = vst.msk [vmem:[#allocation2] sm:$0xf] %vm968_vm11, %v966_v30 }
 0x5d6   : > { %1034 = vst.msk [vmem:[#allocation2] sm:$0xf] %vm1033_vm12, %v1031_v31 }
 0x5e5   : > { %v1096_v32 = vpop.permute.xlu1 %1095 }
 0x5e6   : > { %1099 = vst.msk [vmem:[#allocation2] sm:$0xf] %vm1098_vm13, %v1096_v32 }
 0x5ed   : > { %v1100_v33 = vld [vmem:[#allocation2] sm:$0xf] }
 0x5ee   : > { %1517 = vmatmul.msk.bf16.vlgmr.msra.gmra.mxu1 %vm704_vm0, %v1100_v33 }
 0x66b   : > { %v1133_v35 = vpop.f32.mrf.mxu1 }
 0x66c   : > { %v1134_v36 = vadd.f32 %v1641_v34, %v1133_v35 }
 0x66e   : > { %v1137_v37 = vadd.f32 %v1134_v36, %v2001_v55  ;;  %v1557_v55 = vld [vmem:[%s2193_s13] sm:$0xff] }
 0x66f   : > { %1201 = vmatpush.bf16.msra.mxu2 %v1557_v55 }
 0x670   : > { %v1140_v38 = vsel %vm704_vm0, %v1137_v37, 0.0 }
 0x671   : > { %1141 = vadd.xlane.f32.xlu2 %v1140_v38 }
 0x673   : > { %v1135_v39 = vpop.f32.mrf.mxu1 }
 0x6e4   : > { %v1142_v40 = vpop.xlane.xlu2 %1141 }
 0x6e5   : > { %v1143_v41 = vmul.f32 %v1142_v40, %v1974_v12 }
 0x6e7   : > { %v1144_v42 = vsub.f32 %v1137_v37, %v1143_v41 }
 0x6e9   : > { %v1145_v43 = vmul.f32 %v1144_v42, %v1144_v42 }
 0x6eb   : > { %v1146_v44 = vsel %vm704_vm0, %v1145_v43, 0.0 }
 0x6ec   : > { %1147 = vadd.xlane.f32.xlu0 %v1146_v44 }
 0x75f   : > { %v1148_v46 = vpop.xlane.xlu0 %1147 }
 0x760   : > { %v1149_v47 = vmul.f32 %v1148_v46, %v1974_v12 }
 0x762   : > { %v1150_v48 = vadd.f32 1e-12, %v1149_v47 }
 0x764   : > { %1670 = vrsqrt.f32 %v1150_v48  ;;  %vm1157_vm15 = vweird.f32 %v1150_v48 }
 0x76a   : > { %v1671_v49 = vpop.eup %1670 }
 0x76b   : > { %v1152_v50 = vmul.f32 %v1671_v49, %v1150_v48  ;;  %vm1158_vm14 = vweird.f32 %v1671_v49 }
 0x76c   : > { %vm1159_vm1 = vmor %vm1157_vm15, %vm1158_vm14 }
 0x76d   : > { %v1153_v51 = vmul.f32 %v1671_v49, %v1152_v50 }
 0x76f   : > { %v1154_v52 = vmul.f32 0.5, %v1153_v51 }
 0x771   : > { %v1155_v53 = vsub.f32 1.5, %v1154_v52 }
 0x773   : > { %v1156_v54 = vmul.f32 %v1671_v49, %v1155_v53 }
 0x775   : > { %v1160_v57 = vsel %vm1159_vm1, %v1671_v49, %v1156_v54 }
 0x776   : > { %v1161_v59 = vmul.f32 %v1160_v57, %v1144_v42 }
 0x778   : > { %v1165_v61 = vmul.f32 %v1642_v56, %v1161_v59 }
 0x77a   : > { %v1169_v62 = vadd.f32 %v1643_v58, %v1165_v61 }
 0x77c   : > { %v1170_v63 = vpack.c.bf16 %v1169_v62, %v1169_v62 }
 0x77e   : > { %1526 = vmatmul.msk.bf16.vlgmr.msra.gmra.mxu2 %vm704_vm0, %v1170_v63 }
 0x801   : > { %v1203_v5 = vpop.f32.mrf.mxu2 }
 0x802   : > { %v1204_v6 = vadd.f32 %v1644_v4, %v1203_v5 }
 0x804   : > { %v1208_v7 = vmul.f32 0.044715, %v1204_v6  ;;  %v1207_v15 = vmul.f32 0.5, %v1204_v6 }
 0x806   : > { %v1209_v8 = vmul.f32 %v1208_v7, %v1204_v6 }
 0x808   : > { %v1210_v9 = vmul.f32 %v1209_v8, %v1204_v6 }
 0x809   : > { %v1205_v10 = vpop.f32.mrf.mxu2 }
 0x80a   : > { %v1211_v11 = vadd.f32 %v1210_v9, %v1204_v6 }
 0x80c   : > { %v1212_v13 = vmul.f32 0.7978846, %v1211_v11 }
 0x80e   : > { %1672 = vtanh.f32 %v1212_v13 }
 0x814   : > { %v1673_v14 = vpop.eup %1672 }
 0x815   : > { %v1214_v16 = vadd.f32 1.0, %v1673_v14 }
 0x817   : > { %v1215_v17 = vmul.f32 %v1214_v16, %v1207_v15 }
 0x819   : > { %v1216_v18 = vpack.c.bf16 %v1215_v17, %v1215_v17 }
 0x81b   : > { %1543 = vmatmul.msk.bf16.vlgmr.msrb.gmra.mxu3 %vm1253_vm2, %v1216_v18 }
 0x89e   : > { %v1266_v60 = vpop.f32.mrf.mxu3 }
 0x89f   : > { %v1267_v20 = vadd.f32 %v1645_v19, %v1266_v60 }
 0x8a1   : > { %v1270_v21 = vadd.f32 %v1267_v20, %v1169_v62 }
 0x8a3   : > { %v1273_v22 = vsel %vm704_vm0, %v1270_v21, 0.0 }
 0x8a4   : > { %1274 = vadd.xlane.f32.xlu1 %v1273_v22 }
 0x8a6   : > { %v1268_v23 = vpop.f32.mrf.mxu3 }
 0x917   : > { %v1275_v24 = vpop.xlane.xlu1 %1274 }
 0x918   : > { %v1276_v25 = vmul.f32 %v1275_v24, %v1974_v12 }
 0x91a   : > { %v1277_v26 = vsub.f32 %v1270_v21, %v1276_v25 }
 0x91c   : > { %v1278_v27 = vmul.f32 %v1277_v26, %v1277_v26 }
 0x91e   : > { %v1279_v28 = vsel %vm704_vm0, %v1278_v27, 0.0 }
 0x91f   : > { %1280 = vadd.xlane.f32.xlu2 %v1279_v28 }
 0x920   : > { %1703 = shalt.err (!%p1700_p5)
}
 0x921   : > { %s1799_s26 = smov 64   ;;  %s1800_s19 = smov 4   ;;  %v1646_v38 = vld [vmem:[%s2197_s17] ss:$0 sm:$0xff] }
 0x922   : > { %1565 = dma.vmem_to_hbm [thread:$0]  (%p1946_p4), %s1339_s28, 256, %s1341_s21, %s1310_s3, %s1799_s26, %s1799_s26, %s1800_s19  }
 0x923   : > { %s1476_s6 = sshll.u32 %s2038_s30, 3  ;;  %s1546_s7 = sshll.u32 %s1778_s24, 3 }
 0x924   : > { %s2234_s27 = sld [smem:[#allocation24_spill]]  ;;  %s672_s24 = scalar_lea.vmem [#allocation3], %s1476_s6 }
 0x925   : > { %s2235_s29 = sld [smem:[#allocation23_spill]]  ;;  %s1323_s18 = sshll.u32 %s672_s24, 4  ;;  %s1324_s18 = int_to_ptr.vmem [resolvable:$true] %s1323_s18 }
 0x926   : > { %s1305_s26 = scalar_lea.sflag [#allocation4], %s2038_s30 }
 0x92a   : > { %s1321_s28 = scalar_lea.hbm %s2234_s27, %s1546_s7  ;;  %s1724_s6 = scalar_lea.hbm %s2234_s27, 16 }
 0x92b   : > { %v1647_v40 = vld [vmem:[%s2235_s29] ss:$0 sm:$0xff]  ;;  %s1325_s5 = sshll.u32 %s1321_s28, 4  ;;  %s1326_s5 = int_to_ptr.hbm [resolvable:$true] %s1325_s5 }
 0x92c   : > { %s1718_s19 = sshra.s32 %s1326_s5, 4  ;;  %s1719_s19 = int_to_ptr.hbm [resolvable:$true] %s1718_s19 }
 0x92d   : > { %s1720_s7 = scalar_lea.hbm %s1719_s19, 8  ;;  %p1725_p10 = scmp.lt.s32.totalorder %s1719_s19, %s2234_s27 }
 0x92e   : > { %p1721_p6 = scmp.ne.s32.totalorder %s1719_s19, %s1720_s7  ;;  %p1726_p11 = scmp.lt.s32.totalorder %s1724_s6, %s1720_s7 }
 0x930   : > { %p1722_p7 = pnand %p1721_p6, %p1946_p4  ;;  %p1727_p12 = por %p1726_p11, %p1725_p10 }
 0x932   : > { %p1723_p9 = pneg %p1722_p7 }
 0x934   : > { %p1728_p13 = pnand %p1727_p12, %p1723_p9 }
 0x992   : > { %v1281_v29 = vpop.xlane.xlu2 %1280 }
 0x993   : > { %v1282_v30 = vmul.f32 %v1281_v29, %v1974_v12 }
 0x995   : > { %v1283_v31 = vadd.f32 1e-12, %v1282_v30 }
 0x997   : > { %1674 = vrsqrt.f32 %v1283_v31  ;;  %vm1290_vm4 = vweird.f32 %v1283_v31 }
 0x99d   : > { %v1675_v32 = vpop.eup %1674 }
 0x99e   : > { %v1285_v33 = vmul.f32 %v1675_v32, %v1283_v31  ;;  %vm1291_vm3 = vweird.f32 %v1675_v32 }
 0x99f   : > { %vm1292_vm5 = vmor %vm1290_vm4, %vm1291_vm3 }
 0x9a0   : > { %v1286_v34 = vmul.f32 %v1675_v32, %v1285_v33 }
 0x9a2   : > { %v1287_v35 = vmul.f32 0.5, %v1286_v34 }
 0x9a4   : > { %v1288_v36 = vsub.f32 1.5, %v1287_v35 }
 0x9a6   : > { %v1289_v37 = vmul.f32 %v1675_v32, %v1288_v36 }
 0x9a8   : > { %v1293_v12 = vsel %vm1292_vm5, %v1675_v32, %v1289_v37 }
 0x9a9   : > { %v1294_v39 = vmul.f32 %v1293_v12, %v1277_v26 }
 0x9ab   : > { %v1298_v41 = vmul.f32 %v1646_v38, %v1294_v39 }
 0x9ad   : > { %v1302_v42 = vadd.f32 %v1647_v40, %v1298_v41 }
 0x9af   : > { %1303 = vst.msk [vmem:[%s672_s24] sm:$0xff] %vm704_vm0, %v1302_v42 }
 0x9b0   : > { %1731 = shalt.err (!%p1728_p13)
}
 0x9b1   : > { %1564 = dma.vmem_to_hbm [thread:$0]  (%p1946_p4), %s1324_s18, 128, %s1326_s5, %s1305_s26  }
 0x9b2 PF: > { %s2236_s30 = sld [smem:[#allocation9_spill]]  ;;  %p1575_p0 = scmp.ge.s32.totalorder %s1786_s25, 2 }
 0x9b4   : > { %p1569_p1 = pnand %p1575_p0, %p1953_p8 }
 0x9b6   : > { %p1570_p2 = pneg %p1569_p1 }
 0x9b8   : > { %s1355_s21 = sand.u32 1, %s2236_s30  }
 0x9b9   : > { %s1356_s3 = scalar_lea.sflag [#allocation4], %s1355_s21 }
 0x9ba   : > { %1757 = dma.done.wait (%p1570_p2), %s1356_s3, 128  }
 0x9bb   : > { %1759 = vsyncadd (%p1570_p2), %s1356_s3, 4294967168  ;;  %s1366_s29 = scalar_lea.sflag [#allocation6], %s1355_s21 }
 0x9bc   : > { %1761 = dma.done.wait (%p1570_p2), %s1366_s29, 256  }
 0x9bd   : > { %1763 = vsyncadd (%p1570_p2), %s1366_s29, 4294967040  ;;  %s37_s25 = sadd.s32 1, %s1786_s25   ;;  %s2238_s24 = sld [smem:[#allocation10_spill]] }
 0x9be   : > { %p34_p3 = scmp.ge.s32.totalorder %s37_s25, 4   ;;  %s2239_s2 = sld [smem:[#allocation11_spill]] }
 0x9bf   : > { %s2240_s1 = smov %s1770_s22  ;;  %s2241_s22 = smov %s1774_s23 }
 0x9c0   : > { %s2242_s23 = smov %s1959_s0  ;;  %36 = sbr.rel (!%p34_p3) target bundleno = 19 (0x13), region = 157 }
 0x9c5   :  { %1372 = vsyncpa [#allocation4], 1 }
 0x9c6   :  { %1374 = vsyncpa [#allocation4 + $0x1], 1 }
 0x9c7   :  { %1375 = vsyncpa [#allocation6], 1 }
 0x9c8   :  { %1377 = vsyncpa [#allocation6 + $0x1], 1 }

</bundles_post_ra>
